<compile_context>
chip_gen: v6e
topology: v6e:2x2x1
jax: 0.10.0
libtpu: 0.0.40
codegen_flags: <defaults>
</compile_context>

<pallas_src>
import functools

import jax
import jax.numpy as jnp
from jax import lax
from jax.experimental import pallas as pl
from jax.experimental.pallas import tpu as pltpu

EMBED_DIM = [("month", 13, 2), ("day", 32, 2), ("hour", 25, 2), ("type", 101, 8)]

_TYPE_COL = 6              # train[:, :, 6] is the 'type' semantic
_MAX_TILE_N = 8192         # tokens per grid step (~16 MiB padded, double-buffered)
_CHUNK_N = 256             # rows per inner one-hot matmul chunk
_INNER_UNROLL = 4          # chunks per fori_loop iteration when num_chunks > 8
_MIN_PALLAS_TOKENS = 1024  # below this, plain XLA gather beats kernel launch cost


def _type_embed_kernel(train_ref, table_ref, out_ref, *, chunk, num_chunks):
    """out[n, :] = table[int(train[n, 6]), :] via chunked one-hot matmul."""
    table = table_ref[...]                                  # (V, D) f32, VMEM-resident
    v = table.shape[0]
    # Hoisted: broadcast_in_dim is not CSE'd by JAX; building this inside the
    # (unrolled) chunk loop would re-materialize ~32 vregs per chunk.
    iota = lax.broadcasted_iota(jnp.int32, (chunk, v), 1)

    def do_chunk(start):
        # Fused index extraction: col 6 of the raw feature block; int32 cast
        # truncates toward zero, matching torch .long().
        idx = train_ref[pl.ds(start, chunk), pl.ds(_TYPE_COL, 1)].astype(jnp.int32)
        one_hot = (iota == idx).astype(jnp.float32)         # exact 0/1 -> exact gather
        out_ref[pl.ds(start, chunk), :] = jnp.dot(
            one_hot, table, preferred_element_type=jnp.float32)

    if num_chunks <= 8:
        # Small tile: full static unroll (matches previous behavior).
        for c in range(num_chunks):
            do_chunk(c * chunk)
    else:
        # Large tile: bounded 4x unroll inside a fori_loop keeps code size and
        # vreg pressure in check (num_chunks is guaranteed a multiple of 4).
        group = _INNER_UNROLL * chunk

        def body(o, carry):
            base = pl.multiple_of(o * group, group)
            for t in range(_INNER_UNROLL):
                do_chunk(base + t * chunk)
            return carry

        lax.fori_loop(0, num_chunks // _INNER_UNROLL, body, 0)


def make_params(key):
    """Deterministic synthetic init mirroring nn.Embedding (N(0,1) weights)."""
    params = {}
    for name, num_embeddings, embedding_dim in EMBED_DIM:
        key, sub = jax.random.split(key)
        params[name + "_embed"] = jax.random.normal(
            sub, (num_embeddings, embedding_dim), dtype=jnp.float32)
    return params


def input_module_forward(train, params, *, force_pallas=False):
    """JAX/Pallas equivalent of Input_Module.forward (returns type embedding)."""
    B, S, F = train.shape
    table = params["type_embed"]                            # (101, 8) float32
    V, D = table.shape
    N = B * S

    if N < _MIN_PALLAS_TOKENS and not force_pallas:
        # Fast path: pallas_call launch + pipeline setup dwarfs the work here.
        idx = train[:, :, _TYPE_COL].astype(jnp.int32)
        return jnp.take(table, idx, axis=0)

    train_flat = train.reshape(N, F)

    # Tile sizing: quantized to 4*chunk so that when num_chunks > 8 it is
    # divisible by the 4x inner unroll; capped at 8192 tokens so the padded
    # double-buffered footprint (~16 MiB) fits every generation's VMEM budget.
    tile_quantum = _INNER_UNROLL * _CHUNK_N
    tile_n = min(_MAX_TILE_N, pl.cdiv(N, tile_quantum) * tile_quantum)
    num_chunks = tile_n // _CHUNK_N
    grid = (pl.cdiv(N, tile_n),)

    kernel = functools.partial(_type_embed_kernel, chunk=_CHUNK_N,
                               num_chunks=num_chunks)

    out_flat = pl.pallas_call(
        kernel,
        out_shape=jax.ShapeDtypeStruct((N, D), jnp.float32),
        grid=grid,
        in_specs=[
            # Raw features, tiled over tokens (index column sliced in-kernel).
            pl.BlockSpec((tile_n, F), lambda i: (i, 0)),
            # Embedding table: constant block index -> DMA'd once, resident.
            pl.BlockSpec((V, D), lambda i: (0, 0)),
        ],
        out_specs=pl.BlockSpec((tile_n, D), lambda i: (i, 0)),
        compiler_params=pltpu.CompilerParams(
            dimension_semantics=("parallel",),      # shard tiles across TCs (v7x)
            vmem_limit_bytes=32 * 1024 * 1024,      # ~16 MiB padded usage + scratch
        ),
    )(train_flat, table)

    return out_flat.reshape(B, S, D)


def _make_train(key, B, S, F):
    """Float feature tensor with integer semantics in cols 6..9 (type/month/day/hour)."""
    k_feat, k_type, k_month, k_day, k_hour = jax.random.split(key, 5)
    train = jax.random.normal(k_feat, (B, S, F), dtype=jnp.float32)
    train = train.at[:, :, 6].set(
        jax.random.randint(k_type, (B, S), 0, 101).astype(jnp.float32))
    train = train.at[:, :, 7].set(
        jax.random.randint(k_month, (B, S), 0, 13).astype(jnp.float32))
    train = train.at[:, :, 8].set(
        jax.random.randint(k_day, (B, S), 0, 32).astype(jnp.float32))
    train = train.at[:, :, 9].set(
        jax.random.randint(k_hour, (B, S), 0, 25).astype(jnp.float32))
    return train


if __name__ == "__main__":
    key = jax.random.PRNGKey(0)
    k_param, k_small, k_big = jax.random.split(key, 3)
    params = make_params(k_param)

    # Small shape consistent with the module: batch=2, seq=8, features=10.
    # Force the Pallas path so the kernel itself is exercised at this size.
    B, S, F = 2, 8, 10
    train = _make_train(k_small, B, S, F)
    out = jax.block_until_ready(
        input_module_forward(train, params, force_pallas=True))
    ref = jnp.take(params["type_embed"],
                   train[:, :, 6].astype(jnp.int32), axis=0)
    assert out.shape == (B, S, 8), out.shape
    assert jnp.allclose(out, ref, atol=1e-5), "small-shape mismatch vs reference"

    # Larger (still small) shape exercising multi-tile grid, a partial final
    # tile, and the bounded-unroll (num_chunks > 8) path.
    B2, S2 = 8, 1199                      # N = 9592 -> tile 8192, grid = 2
    train2 = _make_train(k_big, B2, S2, F)
    out2 = jax.block_until_ready(input_module_forward(train2, params))
    ref2 = jnp.take(params["type_embed"],
                    train2[:, :, 6].astype(jnp.int32), axis=0)
    assert out2.shape == (B2, S2, 8), out2.shape
    assert jnp.allclose(out2, ref2, atol=1e-5), "large-shape mismatch vs reference"

    print("KERNEL_OK")
</pallas_src>

<mosaic_0001>
module attributes {stable_mosaic.version = 11 : i64} {
  func.func @_type_embed_kernel(%arg0: i32, %arg1: memref<1024x10xf32, #tpu.memory_space<vmem>>, %arg2: memref<101x8xf32, #tpu.memory_space<vmem>>, %arg3: memref<1024x8xf32, #tpu.memory_space<vmem>>) attributes {dimension_semantics = [#tpu.dimension_semantics<parallel>], iteration_bounds = array<i64: 1>, scalar_prefetch = 0 : i64, scratch_operands = 0 : i64, tpu.core_type = #tpu.core_type<tc>, window_params = [{transform_indices = @transform_0, window_bounds = array<i64: 1024, 10>}, {pipeline_mode = #tpu.pipeline_mode<synchronous>, transform_indices = @transform_1, window_bounds = array<i64: 101, 8>}, {transform_indices = @transform_2, window_bounds = array<i64: 1024, 8>}]} {
    %c0 = arith.constant 0 : index
    %c0_0 = arith.constant 0 : index
    %0 = vector.load %arg2[%c0, %c0_0] : memref<101x8xf32, #tpu.memory_space<vmem>>, vector<101x8xf32>
    %1 = tpu.iota {dimensions = array<i32: 1>} : vector<256x101xi32>
    %c0_1 = arith.constant 0 : index
    %c6 = arith.constant 6 : index
    %2 = vector.load %arg1[%c0_1, %c6] : memref<1024x10xf32, #tpu.memory_space<vmem>>, vector<256x1xf32>
    %3 = arith.fptosi %2 : vector<256x1xf32> to vector<256x1xi32>
    %4 = vector.broadcast %3 : vector<256x1xi32> to vector<256x101xi32>
    %5 = arith.cmpi eq, %1, %4 : vector<256x101xi32>
    %6 = arith.extui %5 : vector<256x101xi1> to vector<256x101xi32>
    %7 = arith.sitofp %6 : vector<256x101xi32> to vector<256x101xf32>
    %cst = arith.constant dense<0.000000e+00> : vector<256x8xf32>
    %8 = tpu.matmul %7, %0, %cst {dimension_numbers = #tpu.dot_dimension_numbers<[1], [0], [0], [1], [0, 0, 1, 1], [], []>} : vector<256x101xf32>, vector<101x8xf32>, vector<256x8xf32> -> vector<256x8xf32>
    %c0_2 = arith.constant 0 : index
    %c0_3 = arith.constant 0 : index
    %9 = vector.load %arg3[%c0_2, %c0_3] : memref<1024x8xf32, #tpu.memory_space<vmem>>, vector<256x8xf32>
    tpu.vector_store %arg3[%c0_2, %c0_3], %8 {strides = array<i32>} : memref<1024x8xf32, #tpu.memory_space<vmem>>, vector<256x8xf32>,
    %c256 = arith.constant 256 : index
    %c6_4 = arith.constant 6 : index
    %10 = vector.load %arg1[%c256, %c6_4] : memref<1024x10xf32, #tpu.memory_space<vmem>>, vector<256x1xf32>
    %11 = arith.fptosi %10 : vector<256x1xf32> to vector<256x1xi32>
    %12 = vector.broadcast %11 : vector<256x1xi32> to vector<256x101xi32>
    %13 = arith.cmpi eq, %1, %12 : vector<256x101xi32>
    %14 = arith.extui %13 : vector<256x101xi1> to vector<256x101xi32>
    %15 = arith.sitofp %14 : vector<256x101xi32> to vector<256x101xf32>
    %cst_5 = arith.constant dense<0.000000e+00> : vector<256x8xf32>
    %16 = tpu.matmul %15, %0, %cst_5 {dimension_numbers = #tpu.dot_dimension_numbers<[1], [0], [0], [1], [0, 0, 1, 1], [], []>} : vector<256x101xf32>, vector<101x8xf32>, vector<256x8xf32> -> vector<256x8xf32>
    %c256_6 = arith.constant 256 : index
    %c0_7 = arith.constant 0 : index
    %17 = vector.load %arg3[%c256_6, %c0_7] : memref<1024x8xf32, #tpu.memory_space<vmem>>, vector<256x8xf32>
    tpu.vector_store %arg3[%c256_6, %c0_7], %16 {strides = array<i32>} : memref<1024x8xf32, #tpu.memory_space<vmem>>, vector<256x8xf32>,
    %c512 = arith.constant 512 : index
    %c6_8 = arith.constant 6 : index
    %18 = vector.load %arg1[%c512, %c6_8] : memref<1024x10xf32, #tpu.memory_space<vmem>>, vector<256x1xf32>
    %19 = arith.fptosi %18 : vector<256x1xf32> to vector<256x1xi32>
    %20 = vector.broadcast %19 : vector<256x1xi32> to vector<256x101xi32>
    %21 = arith.cmpi eq, %1, %20 : vector<256x101xi32>
    %22 = arith.extui %21 : vector<256x101xi1> to vector<256x101xi32>
    %23 = arith.sitofp %22 : vector<256x101xi32> to vector<256x101xf32>
    %cst_9 = arith.constant dense<0.000000e+00> : vector<256x8xf32>
    %24 = tpu.matmul %23, %0, %cst_9 {dimension_numbers = #tpu.dot_dimension_numbers<[1], [0], [0], [1], [0, 0, 1, 1], [], []>} : vector<256x101xf32>, vector<101x8xf32>, vector<256x8xf32> -> vector<256x8xf32>
    %c512_10 = arith.constant 512 : index
    %c0_11 = arith.constant 0 : index
    %25 = vector.load %arg3[%c512_10, %c0_11] : memref<1024x8xf32, #tpu.memory_space<vmem>>, vector<256x8xf32>
    tpu.vector_store %arg3[%c512_10, %c0_11], %24 {strides = array<i32>} : memref<1024x8xf32, #tpu.memory_space<vmem>>, vector<256x8xf32>,
    %c768 = arith.constant 768 : index
    %c6_12 = arith.constant 6 : index
    %26 = vector.load %arg1[%c768, %c6_12] : memref<1024x10xf32, #tpu.memory_space<vmem>>, vector<256x1xf32>
    %27 = arith.fptosi %26 : vector<256x1xf32> to vector<256x1xi32>
    %28 = vector.broadcast %27 : vector<256x1xi32> to vector<256x101xi32>
    %29 = arith.cmpi eq, %1, %28 : vector<256x101xi32>
    %30 = arith.extui %29 : vector<256x101xi1> to vector<256x101xi32>
    %31 = arith.sitofp %30 : vector<256x101xi32> to vector<256x101xf32>
    %cst_13 = arith.constant dense<0.000000e+00> : vector<256x8xf32>
    %32 = tpu.matmul %31, %0, %cst_13 {dimension_numbers = #tpu.dot_dimension_numbers<[1], [0], [0], [1], [0, 0, 1, 1], [], []>} : vector<256x101xf32>, vector<101x8xf32>, vector<256x8xf32> -> vector<256x8xf32>
    %c768_14 = arith.constant 768 : index
    %c0_15 = arith.constant 0 : index
    %33 = vector.load %arg3[%c768_14, %c0_15] : memref<1024x8xf32, #tpu.memory_space<vmem>>, vector<256x8xf32>
    tpu.vector_store %arg3[%c768_14, %c0_15], %32 {strides = array<i32>} : memref<1024x8xf32, #tpu.memory_space<vmem>>, vector<256x8xf32>,
    return
  }
  func.func @transform_0(%arg0: i32) -> (i32, i32) {
    %c0_i32 = arith.constant 0 : i32
    %c0_i32_0 = arith.constant 0 : i32
    return %arg0, %c0_i32 : i32, i32
  }
  func.func @transform_1(%arg0: i32) -> (i32, i32) {
    %c0_i32 = arith.constant 0 : i32
    %c0_i32_0 = arith.constant 0 : i32
    %c0_i32_1 = arith.constant 0 : i32
    return %c0_i32, %c0_i32_0 : i32, i32
  }
  func.func @transform_2(%arg0: i32) -> (i32, i32) {
    %c0_i32 = arith.constant 0 : i32
    %c0_i32_0 = arith.constant 0 : i32
    return %arg0, %c0_i32 : i32, i32
  }
}

</mosaic_0001>

<bundles_post_ra>
// kernel: tpu_custom_call.1
= control target key start
LH: loop header
LB: loop body
LE: loop exit
PB: predicated region body
PF: predicated region fallthrough
CT: control target
= control target key end

     0   :  { %v3522_v3 = vmov 6   ;;  %vm379_vm0 = vcmask 1044480   ;;  %vm282_vm1 = vcmask 826368   ;;  %s4506_s0 = inlined_call_operand.vmem [shape: f32[16,10], index: 0, kind: input, shape index: {}]   ;;  %s4507_s1 = inlined_call_operand.vmem [shape: f32[101,8], index: 1, kind: input, shape index: {}]   ;;  %s4508_s2 = inlined_call_operand.vmem [shape: f32[16,8], index: 2, kind: output, shape index: {}]  }
   0x1   :  { %v28_v0 = vld [vmem:[%s4506_s0 + $0x10] sm:$0xff]  ;;  %v26_v1 = vld [vmem:[%s4506_s0] sm:$0xff]  ;;  %v29_v2 = vld [vmem:[%s4506_s0 + $0x18] sm:$0xff]  ;;  %3508 = vset.pattern.permute.xlu1 %v3522_v3  ;;  %3507 = vset.pattern.permute.xlu0 %v3522_v3 }
   0x2   :  { %v3253_v4 = vtrunc.f32 %v28_v0  ;;  %v3249_v5 = vtrunc.f32 %v26_v1  ;;  %v3255_v6 = vtrunc.f32 %v29_v2  ;;  %v27_v7 = vld [vmem:[%s4506_s0 + $0x8] sm:$0xff]  ;;  %v30_v10 = vld [vmem:[%s4506_s0 + $0x20] sm:$0xff]  ;;  %v33_v17 = vld [vmem:[%s4506_s0 + $0x38] sm:$0xff] }
   0x3   :  { %v3251_v8 = vtrunc.f32 %v27_v7  ;;  %v31_v9 = vld [vmem:[%s4506_s0 + $0x28] sm:$0xff]  ;;  %v3257_v16 = vtrunc.f32 %v30_v10  ;;  %v32_v18 = vld [vmem:[%s4506_s0 + $0x30] sm:$0xff]  ;;  %v3263_v21 = vtrunc.f32 %v33_v17  ;;  %v34_v24 = vld [vmem:[%s4506_s0 + $0x40] sm:$0xff] }
   0x4   :  { %v3254_v11 = vcvt.f32.s32 %v3253_v4  ;;  %v3250_v12 = vcvt.f32.s32 %v3249_v5  ;;  %v3256_v13 = vcvt.f32.s32 %v3255_v6  ;;  %v3259_v15 = vtrunc.f32 %v31_v9  ;;  %v35_v23 = vld [vmem:[%s4506_s0 + $0x48] sm:$0xff]  ;;  %v37_v29 = vld [vmem:[%s4506_s0 + $0x58] sm:$0xff]  ;;  %v36_v30 = vld [vmem:[%s4506_s0 + $0x50] sm:$0xff] }
   0x5   :  { %v3252_v14 = vcvt.f32.s32 %v3251_v8  ;;  %v3258_v20 = vcvt.f32.s32 %v3257_v16  ;;  %v3261_v22 = vtrunc.f32 %v32_v18  ;;  %v3264_v25 = vcvt.f32.s32 %v3263_v21  ;;  %v39_v35 = vld [vmem:[%s4506_s0 + $0x68] sm:$0xff]  ;;  %v38_v36 = vld [vmem:[%s4506_s0 + $0x60] sm:$0xff]  ;;  %v3591_v38 = vld [vmem:[%s4507_s1 + $0x58] sm:$0xff] }
   0x6   :  { %97 = vperm.xlu1 %3508, %v3254_v11   ;;  %91 = vperm.xlu0 %3507, %v3250_v12   ;;  %v3260_v19 = vcvt.f32.s32 %v3259_v15  ;;  %v3267_v27 = vtrunc.f32 %v35_v23  ;;  %v3265_v28 = vtrunc.f32 %v34_v24  ;;  %v3271_v33 = vtrunc.f32 %v37_v29  ;;  %v3584_v37 = vld [vmem:[%s4507_s1 + $0x60] sm:$0x1f]  ;;  %v3602_v43 = vld [vmem:[%s4507_s1 + $0x50] sm:$0xff]  ;;  %v41_v44 = vld [vmem:[%s4506_s0 + $0x78] sm:$0xff] }
   0x7   :  { %v3262_v26 = vcvt.f32.s32 %v3261_v22  ;;  %v3269_v34 = vtrunc.f32 %v36_v30  ;;  %2953 = vmatprep.subr.msk.mxu0 %vm379_vm0, %v3584_v37  ;;  %3027 = vmatprep.subr.msk.mxu1 %vm379_vm0, %v3584_v37  ;;  %v3275_v41 = vtrunc.f32 %v39_v35  ;;  %v3273_v42 = vtrunc.f32 %v38_v36  ;;  %v40_v45 = vld [vmem:[%s4506_s0 + $0x70] sm:$0xff]  ;;  %v3618_v46 = vld [vmem:[%s4507_s1 + $0x48] sm:$0xff]  ;;  %v42_v52 = vld [vmem:[%s4506_s0 + $0x80] sm:$0xff] }
   0x8   :  { %v3268_v31 = vcvt.f32.s32 %v3267_v27  ;;  %v3266_v32 = vcvt.f32.s32 %v3265_v28  ;;  %2954 = vmatpush3.msk.msra.mxu0 %vm379_vm0, %v3584_v37  ;;  %3028 = vmatpush3.msk.msra.mxu1 %vm379_vm0, %v3584_v37  ;;  %v3272_v39 = vcvt.f32.s32 %v3271_v33  ;;  %v3279_v49 = vtrunc.f32 %v41_v44  ;;  %v43_v51 = vld [vmem:[%s4506_s0 + $0x88] sm:$0xff]  ;;  %v3633_v53 = vld [vmem:[%s4507_s1 + $0x40] sm:$0xff]  ;;  %v3641_v58 = vld [vmem:[%s4507_s1 + $0x38] sm:$0xff] }
   0x9   :  { %v3270_v40 = vcvt.f32.s32 %v3269_v34  ;;  %2955 = vmatprep.subr.mxu0 %v3591_v38  ;;  %3029 = vmatprep.subr.mxu1 %v3591_v38  ;;  %v3276_v47 = vcvt.f32.s32 %v3275_v41  ;;  %v3274_v48 = vcvt.f32.s32 %v3273_v42  ;;  %v3277_v50 = vtrunc.f32 %v40_v45  ;;  %v45_v59 = vld [vmem:[%s4506_s0 + $0x98] sm:$0xff]  ;;  %v44_v60 = vld [vmem:[%s4506_s0 + $0x90] sm:$0xff]  ;;  %v47_v2 = vld [vmem:[%s4506_s0 + $0xa8] sm:$0xff] }
   0xa   :  { %100 = vperm.xlu1 %3508, %v3256_v13   ;;  %94 = vperm.xlu0 %3507, %v3252_v14   ;;  %v3280_v54 = vcvt.f32.s32 %v3279_v49  ;;  %v3283_v56 = vtrunc.f32 %v43_v51  ;;  %v3281_v57 = vtrunc.f32 %v42_v52  ;;  %v3657_v61 = vld [vmem:[%s4507_s1 + $0x30] sm:$0xff]  ;;  %v3287_v0 = vtrunc.f32 %v45_v59  ;;  %v46_v3 = vld [vmem:[%s4506_s0 + $0xa0] sm:$0xff]  ;;  %v3672_v4 = vld [vmem:[%s4507_s1 + $0x28] sm:$0xff] }
   0xb   :  { %2956 = vmatpush3.msra.mxu0 %v3591_v38  ;;  %3030 = vmatpush3.msra.mxu1 %v3591_v38  ;;  %v3278_v55 = vcvt.f32.s32 %v3277_v50  ;;  %v3285_v1 = vtrunc.f32 %v44_v60  ;;  %v3291_v7 = vtrunc.f32 %v47_v2  ;;  %v3289_v8 = vtrunc.f32 %v46_v3  ;;  %v3680_v9 = vld [vmem:[%s4507_s1 + $0x20] sm:$0xff]  ;;  %v49_v10 = vld [vmem:[%s4506_s0 + $0xb8] sm:$0xff]  ;;  %v48_v11 = vld [vmem:[%s4506_s0 + $0xb0] sm:$0xff] }
   0xc   :  { %2957 = vmatprep.subr.mxu0 %v3602_v43  ;;  %3031 = vmatprep.subr.mxu1 %v3602_v43  ;;  %v3284_v62 = vcvt.f32.s32 %v3283_v56  ;;  %v3282_v63 = vcvt.f32.s32 %v3281_v57  ;;  %v3288_v5 = vcvt.f32.s32 %v3287_v0  ;;  %v3696_v12 = vld [vmem:[%s4507_s1 + $0x18] sm:$0xff]  ;;  %v3295_v15 = vtrunc.f32 %v49_v10  ;;  %v51_v17 = vld [vmem:[%s4506_s0 + $0xc8] sm:$0xff]  ;;  %v50_v18 = vld [vmem:[%s4506_s0 + $0xc0] sm:$0xff] }
   0xd   :  { %2958 = vmatpush3.msra.mxu0 %v3602_v43  ;;  %3032 = vmatpush3.msra.mxu1 %v3602_v43  ;;  %v3286_v6 = vcvt.f32.s32 %v3285_v1  ;;  %v3292_v13 = vcvt.f32.s32 %v3291_v7  ;;  %v3290_v14 = vcvt.f32.s32 %v3289_v8  ;;  %v3293_v16 = vtrunc.f32 %v48_v11  ;;  %v3719_v24 = vld [vmem:[%s4507_s1 + $0x8] sm:$0xff]  ;;  %v3735_v27 = vld [vmem:[%s4507_s1] sm:$0xff]  ;;  %v56_v41 = vld [vmem:[%s4506_s0 + $0xf0] sm:$0xff] }
   0xe   :  { %106 = vperm.xlu1 %3508, %v3260_v19   ;;  %103 = vperm.xlu0 %3507, %v3258_v20   ;;  %v3711_v19 = vld [vmem:[%s4507_s1 + $0x10] sm:$0xff]  ;;  %v3296_v20 = vcvt.f32.s32 %v3295_v15  ;;  %v3299_v22 = vtrunc.f32 %v51_v17  ;;  %v3297_v23 = vtrunc.f32 %v50_v18  ;;  %v54_v33 = vld [vmem:[%s4506_s0 + $0xe0] sm:$0xff] }
   0xf   :  { %2959 = vmatprep.subr.mxu0 %v3618_v46  ;;  %3033 = vmatprep.subr.mxu1 %v3618_v46  ;;  %v3294_v21 = vcvt.f32.s32 %v3293_v16  ;;  %v641_v49 = vld [vmem:[%s4506_s0 + $0x100] sm:$0xff]  ;;  %v643_v56 = vld [vmem:[%s4506_s0 + $0x110] sm:$0xff] }
  0x10   :  { %2960 = vmatpush3.msra.mxu0 %v3618_v46  ;;  %3034 = vmatpush3.msra.mxu1 %v3618_v46  ;;  %v3300_v28 = vcvt.f32.s32 %v3299_v22  ;;  %v3298_v29 = vcvt.f32.s32 %v3297_v23  ;;  %v645_v0 = vld [vmem:[%s4506_s0 + $0x120] sm:$0xff]  ;;  %v647_v7 = vld [vmem:[%s4506_s0 + $0x130] sm:$0xff] }
  0x11   :  { %2961 = vmatprep.subr.mxu0 %v3633_v53  ;;  %3035 = vmatprep.subr.mxu1 %v3633_v53  ;;  %v649_v15 = vld [vmem:[%s4506_s0 + $0x140] sm:$0xff]  ;;  %v651_v22 = vld [vmem:[%s4506_s0 + $0x150] sm:$0xff] }
  0x12   :  { %112 = vperm.xlu1 %3508, %v3264_v25   ;;  %109 = vperm.xlu0 %3507, %v3262_v26   ;;  %v53_v25 = vld [vmem:[%s4506_s0 + $0xd8] sm:$0xff]  ;;  %v52_v26 = vld [vmem:[%s4506_s0 + $0xd0] sm:$0xff] }
  0x13   :  { %2962 = vmatpush3.msra.mxu0 %v3633_v53  ;;  %3036 = vmatpush3.msra.mxu1 %v3633_v53  ;;  %v3303_v30 = vtrunc.f32 %v53_v25 }
  0x14   :  { %2963 = vmatprep.subr.mxu0 %v3641_v58  ;;  %3037 = vmatprep.subr.mxu1 %v3641_v58 }
  0x15   :  { %2964 = vmatpush3.msra.mxu0 %v3641_v58  ;;  %3038 = vmatpush3.msra.mxu1 %v3641_v58  ;;  %v3304_v34 = vcvt.f32.s32 %v3303_v30  ;;  %v653_v30 = vld [vmem:[%s4506_s0 + $0x160] sm:$0xff] }
  0x16   :  { %118 = vperm.xlu1 %3508, %v3268_v31   ;;  %115 = vperm.xlu0 %3507, %v3266_v32   ;;  %v3301_v31 = vtrunc.f32 %v52_v26  ;;  %v55_v32 = vld [vmem:[%s4506_s0 + $0xe8] sm:$0xff] }
  0x17   :  { %2965 = vmatprep.subr.mxu0 %v3657_v61  ;;  %3039 = vmatprep.subr.mxu1 %v3657_v61  ;;  %v3307_v36 = vtrunc.f32 %v55_v32 }
  0x18   :  { %2966 = vmatpush3.msra.mxu0 %v3657_v61  ;;  %3040 = vmatpush3.msra.mxu1 %v3657_v61  ;;  %v3302_v35 = vcvt.f32.s32 %v3301_v31 }
  0x19   :  { %2967 = vmatprep.subr.mxu0 %v3672_v4  ;;  %3041 = vmatprep.subr.mxu1 %v3672_v4  ;;  %v3308_v42 = vcvt.f32.s32 %v3307_v36  ;;  %v655_v36 = vld [vmem:[%s4506_s0 + $0x170] sm:$0xff] }
  0x1a   :  { %124 = vperm.xlu1 %3508, %v3272_v39   ;;  %121 = vperm.xlu0 %3507, %v3270_v40   ;;  %v3305_v39 = vtrunc.f32 %v54_v33  ;;  %v57_v40 = vld [vmem:[%s4506_s0 + $0xf8] sm:$0xff] }
  0x1b   :  { %2968 = vmatpush3.msra.mxu0 %v3672_v4  ;;  %3042 = vmatpush3.msra.mxu1 %v3672_v4  ;;  %v3311_v45 = vtrunc.f32 %v57_v40 }
  0x1c   :  { %2969 = vmatprep.subr.mxu0 %v3680_v9  ;;  %3043 = vmatprep.subr.mxu1 %v3680_v9  ;;  %v3306_v44 = vcvt.f32.s32 %v3305_v39 }
  0x1d   :  { %2970 = vmatpush3.msra.mxu0 %v3680_v9  ;;  %3044 = vmatpush3.msra.mxu1 %v3680_v9  ;;  %v3312_v50 = vcvt.f32.s32 %v3311_v45  ;;  %v657_v45 = vld [vmem:[%s4506_s0 + $0x180] sm:$0xff] }
  0x1e   :  { %130 = vperm.xlu1 %3508, %v3276_v47   ;;  %127 = vperm.xlu0 %3507, %v3274_v48   ;;  %v3309_v47 = vtrunc.f32 %v56_v41  ;;  %v642_v48 = vld [vmem:[%s4506_s0 + $0x108] sm:$0xff] }
  0x1f   :  { %2971 = vmatprep.subr.mxu0 %v3696_v12  ;;  %3045 = vmatprep.subr.mxu1 %v3696_v12  ;;  %v3315_v52 = vtrunc.f32 %v642_v48 }
  0x20   :  { %2972 = vmatpush3.msra.mxu0 %v3696_v12  ;;  %3046 = vmatpush3.msra.mxu1 %v3696_v12  ;;  %v3310_v51 = vcvt.f32.s32 %v3309_v47 }
  0x21   :  { %2973 = vmatprep.subr.mxu0 %v3711_v19  ;;  %3047 = vmatprep.subr.mxu1 %v3711_v19  ;;  %v3316_v57 = vcvt.f32.s32 %v3315_v52  ;;  %v659_v52 = vld [vmem:[%s4506_s0 + $0x190] sm:$0xff] }
  0x22   :  { %136 = vperm.xlu1 %3508, %v3280_v54   ;;  %133 = vperm.xlu0 %3507, %v3278_v55   ;;  %v3313_v54 = vtrunc.f32 %v641_v49  ;;  %v644_v55 = vld [vmem:[%s4506_s0 + $0x118] sm:$0xff] }
  0x23   :  { %2974 = vmatpush3.msra.mxu0 %v3711_v19  ;;  %3048 = vmatpush3.msra.mxu1 %v3711_v19  ;;  %v3319_v60 = vtrunc.f32 %v644_v55 }
  0x24   :  { %2975 = vmatprep.subr.mxu0 %v3719_v24  ;;  %3049 = vmatprep.subr.mxu1 %v3719_v24  ;;  %v3314_v59 = vcvt.f32.s32 %v3313_v54 }
  0x25   :  { %2976 = vmatpush3.msra.mxu0 %v3719_v24  ;;  %3050 = vmatpush3.msra.mxu1 %v3719_v24  ;;  %v3320_v1 = vcvt.f32.s32 %v3319_v60  ;;  %v661_v60 = vld [vmem:[%s4506_s0 + $0x1a0] sm:$0xff] }
  0x26   :  { %142 = vperm.xlu1 %3508, %v3284_v62   ;;  %139 = vperm.xlu0 %3507, %v3282_v63   ;;  %v3317_v62 = vtrunc.f32 %v643_v56  ;;  %v646_v63 = vld [vmem:[%s4506_s0 + $0x128] sm:$0xff] }
  0x27   :  { %2977 = vmatprep.subr.mxu0 %v3735_v27  ;;  %3051 = vmatprep.subr.mxu1 %v3735_v27  ;;  %v3323_v3 = vtrunc.f32 %v646_v63 }
  0x28   :  { %2978 = vmatpush3.msra.mxu0 %v3735_v27  ;;  %3052 = vmatpush3.msra.mxu1 %v3735_v27  ;;  %v3318_v2 = vcvt.f32.s32 %v3317_v62 }
  0x29   :  { %3101 = vmatprep.subr.msk.mxu0 %vm379_vm0, %v3584_v37  ;;  %3175 = vmatprep.subr.msk.mxu1 %vm379_vm0, %v3584_v37  ;;  %v3324_v8 = vcvt.f32.s32 %v3323_v3  ;;  %v663_v3 = vld [vmem:[%s4506_s0 + $0x1b0] sm:$0xff] }
  0x2a   :  { %148 = vperm.xlu1 %3508, %v3288_v5   ;;  %145 = vperm.xlu0 %3507, %v3286_v6   ;;  %v3321_v5 = vtrunc.f32 %v645_v0  ;;  %v648_v6 = vld [vmem:[%s4506_s0 + $0x138] sm:$0xff] }
  0x2b   :  { %v3327_v11 = vtrunc.f32 %v648_v6 }
  0x2c   :  { %v3322_v10 = vcvt.f32.s32 %v3321_v5 }
  0x2d   :  { %v3328_v16 = vcvt.f32.s32 %v3327_v11  ;;  %v665_v11 = vld [vmem:[%s4506_s0 + $0x1c0] sm:$0xff] }
  0x2e   :  { %154 = vperm.xlu1 %3508, %v3292_v13   ;;  %151 = vperm.xlu0 %3507, %v3290_v14   ;;  %v3325_v13 = vtrunc.f32 %v647_v7  ;;  %v650_v14 = vld [vmem:[%s4506_s0 + $0x148] sm:$0xff] }
  0x2f   :  { %v3331_v18 = vtrunc.f32 %v650_v14 }
  0x30   :  { %v3326_v17 = vcvt.f32.s32 %v3325_v13 }
  0x31   :  { %v3332_v23 = vcvt.f32.s32 %v3331_v18  ;;  %v667_v18 = vld [vmem:[%s4506_s0 + $0x1d0] sm:$0xff] }
  0x32   :  { %160 = vperm.xlu1 %3508, %v3296_v20   ;;  %157 = vperm.xlu0 %3507, %v3294_v21   ;;  %v3329_v20 = vtrunc.f32 %v649_v15  ;;  %v652_v21 = vld [vmem:[%s4506_s0 + $0x158] sm:$0xff] }
  0x33   :  { %v3335_v26 = vtrunc.f32 %v652_v21 }
  0x34   :  { %v3330_v25 = vcvt.f32.s32 %v3329_v20 }
  0x35   :  { %v3336_v31 = vcvt.f32.s32 %v3335_v26  ;;  %v669_v26 = vld [vmem:[%s4506_s0 + $0x1e0] sm:$0xff] }
  0x36   :  { %166 = vperm.xlu1 %3508, %v3300_v28   ;;  %163 = vperm.xlu0 %3507, %v3298_v29   ;;  %v3333_v28 = vtrunc.f32 %v651_v22  ;;  %v654_v29 = vld [vmem:[%s4506_s0 + $0x168] sm:$0xff] }
  0x37   :  { %v3339_v33 = vtrunc.f32 %v654_v29 }
  0x38   :  { %v3334_v32 = vcvt.f32.s32 %v3333_v28 }
  0x39   :  { %v3340_v39 = vcvt.f32.s32 %v3339_v33  ;;  %v671_v33 = vld [vmem:[%s4506_s0 + $0x1f0] sm:$0xff] }
  0x3a   :  { %172 = vperm.xlu1 %3508, %v3304_v34   ;;  %169 = vperm.xlu0 %3507, %v3302_v35   ;;  %v3337_v34 = vtrunc.f32 %v653_v30  ;;  %v656_v35 = vld [vmem:[%s4506_s0 + $0x178] sm:$0xff] }
  0x3b   :  { %v3343_v41 = vtrunc.f32 %v656_v35 }
  0x3c   :  { %v3338_v40 = vcvt.f32.s32 %v3337_v34  ;;  %v24_v34 = vlaneseq }
  0x3d   :  { %v3344_v47 = vcvt.f32.s32 %v3343_v41  ;;  %v1859_v41 = vld [vmem:[%s4506_s0 + $0x300] sm:$0xff] }
  0x3e   :  { %178 = vperm.xlu1 %3508, %v3308_v42   ;;  %175 = vperm.xlu0 %3507, %v3306_v44   ;;  %v3341_v42 = vtrunc.f32 %v655_v36  ;;  %v658_v44 = vld [vmem:[%s4506_s0 + $0x188] sm:$0xff] }
  0x3f   :  { %v3347_v49 = vtrunc.f32 %v658_v44  ;;  %v3862_v44 = vand.u32 127, %v24_v34 }
  0x40   :  { %v3342_v48 = vcvt.f32.s32 %v3341_v42  ;;  %v1250_v42 = vld [vmem:[%s4506_s0 + $0x200] sm:$0xff] }
  0x41   :  { %v3348_v54 = vcvt.f32.s32 %v3347_v49  ;;  %v3377_v49 = vtrunc.f32 %v1250_v42 }
  0x42   :  { %184 = vperm.xlu1 %3508, %v3312_v50   ;;  %181 = vperm.xlu0 %3507, %v3310_v51   ;;  %v3345_v50 = vtrunc.f32 %v657_v45  ;;  %v660_v51 = vld [vmem:[%s4506_s0 + $0x198] sm:$0xff] }
  0x43   :  { %v3351_v56 = vtrunc.f32 %v660_v51  ;;  %v1251_v51 = vld [vmem:[%s4506_s0 + $0x208] sm:$0xff] }
  0x44   :  { %v3346_v55 = vcvt.f32.s32 %v3345_v50  ;;  %v1860_v50 = vld [vmem:[%s4506_s0 + $0x308] sm:$0xff] }
  0x45   :  { %v3352_v62 = vcvt.f32.s32 %v3351_v56 }
  0x46   :  { %709 = vperm.xlu1 %3508, %v3316_v57   ;;  %706 = vperm.xlu0 %3507, %v3314_v59   ;;  %v3349_v57 = vtrunc.f32 %v659_v52  ;;  %v662_v59 = vld [vmem:[%s4506_s0 + $0x1a8] sm:$0xff] }
  0x47   :  { %v3355_v0 = vtrunc.f32 %v662_v59  ;;  %v3379_v59 = vtrunc.f32 %v1251_v51 }
  0x48   :  { %v3350_v63 = vcvt.f32.s32 %v3349_v57  ;;  %v3378_v57 = vcvt.f32.s32 %v3377_v49  ;;  %v1256_v49 = vld [vmem:[%s4506_s0 + $0x230] sm:$0xff] }
  0x49   :  { %v3356_v5 = vcvt.f32.s32 %v3355_v0  ;;  %v1252_v0 = vld [vmem:[%s4506_s0 + $0x210] sm:$0xff] }
  0x4a   :  { %715 = vperm.xlu1 %3508, %v3320_v1   ;;  %712 = vperm.xlu0 %3507, %v3318_v2   ;;  %v3353_v1 = vtrunc.f32 %v661_v60  ;;  %v664_v2 = vld [vmem:[%s4506_s0 + $0x1b8] sm:$0xff]  ;;  %v1861_v60 = vld [vmem:[%s4506_s0 + $0x310] sm:$0xff] }
  0x4b   :  { %v3359_v7 = vtrunc.f32 %v664_v2 }
  0x4c   :  { %v3354_v6 = vcvt.f32.s32 %v3353_v1 }
  0x4d   :  { %v3360_v13 = vcvt.f32.s32 %v3359_v7  ;;  %v3381_v7 = vtrunc.f32 %v1252_v0 }
  0x4e   :  { %721 = vperm.xlu1 %3508, %v3324_v8   ;;  %718 = vperm.xlu0 %3507, %v3322_v10   ;;  %v3357_v8 = vtrunc.f32 %v663_v3  ;;  %v666_v10 = vld [vmem:[%s4506_s0 + $0x1c8] sm:$0xff]  ;;  %v3445_v3 = vtrunc.f32 %v1861_v60  ;;  %v1257_v60 = vld [vmem:[%s4506_s0 + $0x238] sm:$0xff] }
  0x4f   :  { %v3363_v15 = vtrunc.f32 %v666_v10 }
  0x50   :  { %v3358_v14 = vcvt.f32.s32 %v3357_v8  ;;  %v1862_v8 = vld [vmem:[%s4506_s0 + $0x318] sm:$0xff] }
  0x51   :  { %v3364_v20 = vcvt.f32.s32 %v3363_v15 }
  0x52   :  { %727 = vperm.xlu1 %3508, %v3328_v16   ;;  %724 = vperm.xlu0 %3507, %v3326_v17   ;;  %v3361_v16 = vtrunc.f32 %v665_v11  ;;  %v668_v17 = vld [vmem:[%s4506_s0 + $0x1d8] sm:$0xff] }
  0x53   :  { %v3367_v22 = vtrunc.f32 %v668_v17  ;;  %v1253_v11 = vld [vmem:[%s4506_s0 + $0x218] sm:$0xff]  ;;  %v3446_v17 = vcvt.f32.s32 %v3445_v3  ;;  %v3391_v3 = vtrunc.f32 %v1257_v60 }
  0x54   :  { %v3362_v21 = vcvt.f32.s32 %v3361_v16  ;;  %v3447_v16 = vtrunc.f32 %v1862_v8  ;;  %v1258_v8 = vld [vmem:[%s4506_s0 + $0x240] sm:$0xff] }
  0x55   :  { %v3368_v28 = vcvt.f32.s32 %v3367_v22 }
  0x56   :  { %733 = vperm.xlu1 %3508, %v3332_v23   ;;  %730 = vperm.xlu0 %3507, %v3330_v25   ;;  %v3365_v23 = vtrunc.f32 %v667_v18  ;;  %v670_v25 = vld [vmem:[%s4506_s0 + $0x1e8] sm:$0xff]  ;;  %v3382_v18 = vcvt.f32.s32 %v3381_v7  ;;  %v1867_v7 = vld [vmem:[%s4506_s0 + $0x340] sm:$0xff] }
  0x57   :  { %v3371_v30 = vtrunc.f32 %v670_v25  ;;  %v1254_v25 = vld [vmem:[%s4506_s0 + $0x220] sm:$0xff] }
  0x58   :  { %v3366_v29 = vcvt.f32.s32 %v3365_v23  ;;  %v1863_v23 = vld [vmem:[%s4506_s0 + $0x320] sm:$0xff] }
  0x59   :  { %v3372_v35 = vcvt.f32.s32 %v3371_v30  ;;  %v3449_v30 = vtrunc.f32 %v1863_v23 }
  0x5a   :  { %739 = vperm.xlu1 %3508, %v3336_v31   ;;  %736 = vperm.xlu0 %3507, %v3334_v32   ;;  %v3369_v31 = vtrunc.f32 %v669_v26  ;;  %v672_v32 = vld [vmem:[%s4506_s0 + $0x1f8] sm:$0xff] }
  0x5c   :  { %v3370_v36 = vcvt.f32.s32 %v3369_v31  ;;  %v3385_v31 = vtrunc.f32 %v1254_v25 }
  0x5e   :  { %745 = vperm.xlu1 %3508, %v3340_v39   ;;  %742 = vperm.xlu0 %3507, %v3338_v40   ;;  %v3375_v39 = vtrunc.f32 %v672_v32  ;;  %v3373_v40 = vtrunc.f32 %v671_v33  ;;  %v1864_v32 = vld [vmem:[%s4506_s0 + $0x328] sm:$0xff] }
  0x60   :  { %v3376_v45 = vcvt.f32.s32 %v3375_v39  ;;  %v3451_v39 = vtrunc.f32 %v1864_v32 }
  0x62   :  { %751 = vperm.xlu1 %3508, %v3344_v47   ;;  %748 = vperm.xlu0 %3507, %v3342_v48   ;;  %v3374_v47 = vcvt.f32.s32 %v3373_v40  ;;  %v3441_v48 = vtrunc.f32 %v1859_v41  ;;  %v3450_v40 = vcvt.f32.s32 %v3449_v30  ;;  %v3386_v41 = vcvt.f32.s32 %v3385_v31  ;;  %v1260_v30 = vld [vmem:[%s4506_s0 + $0x250] sm:$0xff] }
  0x64   :  { %v3442_v56 = vcvt.f32.s32 %v3441_v48 }
  0x66   :  { %757 = vperm.xlu1 %3508, %v3348_v54   ;;  %754 = vperm.xlu0 %3507, %v3346_v55   ;;  %v3443_v55 = vtrunc.f32 %v1860_v50 }
  0x6a   :  { %763 = vperm.xlu1 %3508, %v3352_v62   ;;  %760 = vperm.xlu0 %3507, %v3350_v63   ;;  %v3523_v62 = vmov 0.0  }
  0x6e   :  { %769 = vperm.xlu1 %3508, %v3356_v5   ;;  %766 = vperm.xlu0 %3507, %v3354_v6   ;;  %v3444_v5 = vcvt.f32.s32 %v3443_v55  ;;  %v3380_v6 = vcvt.f32.s32 %v3379_v59  ;;  %v3389_v55 = vtrunc.f32 %v1256_v49  ;;  %v1871_v49 = vld [vmem:[%s4506_s0 + $0x360] sm:$0xff] }
  0x72   :  { %775 = vperm.xlu1 %3508, %v3360_v13   ;;  %772 = vperm.xlu0 %3507, %v3358_v14  }
  0x76   :  { %781 = vperm.xlu1 %3508, %v3364_v20   ;;  %778 = vperm.xlu0 %3507, %v3362_v21   ;;  %v3383_v20 = vtrunc.f32 %v1253_v11 }
  0x7a   :  { %787 = vperm.xlu1 %3508, %v3368_v28   ;;  %784 = vperm.xlu0 %3507, %v3366_v29   ;;  %v3448_v28 = vcvt.f32.s32 %v3447_v16  ;;  %v3384_v29 = vcvt.f32.s32 %v3383_v20  ;;  %v1868_v16 = vld [vmem:[%s4506_s0 + $0x348] sm:$0xff] }
  0x7b   :  { %v1259_v20 = vld [vmem:[%s4506_s0 + $0x248] sm:$0xff] }
  0x7e   :  { %793 = vperm.xlu1 %3508, %v3372_v35   ;;  %790 = vperm.xlu0 %3507, %v3370_v36   ;;  %v1255_v35 = vld [vmem:[%s4506_s0 + $0x228] sm:$0xff] }
  0x7f   :  { %v3387_v42 = vtrunc.f32 %v1255_v35  ;;  %v3397_v35 = vtrunc.f32 %v1260_v30 }
  0x81   :  { %v98_v52 = vpop.permute.xlu1 %97  ;;  %v92_v54 = vpop.permute.xlu0 %91 }
  0x82   :  { %799 = vperm.xlu1 %3508, %v3376_v45   ;;  %796 = vperm.xlu0 %3507, %v3374_v47   ;;  %vm186_vm2 = vcmp.eq.s32.totalorder %v3862_v44, %v92_v54  ;;  %vm188_vm3 = vcmp.eq.s32.totalorder %v3862_v44, %v98_v52  ;;  %v1865_v45 = vld [vmem:[%s4506_s0 + $0x330] sm:$0xff]  ;;  %v3452_v52 = vcvt.f32.s32 %v3451_v39  ;;  %v3388_v54 = vcvt.f32.s32 %v3387_v42  ;;  %v1870_v39 = vld [vmem:[%s4506_s0 + $0x358] sm:$0xff] }
  0x83   :  { %v2513_v63 = vsel %vm186_vm2, 1.0, %v3523_v62  ;;  %v2515_v13 = vsel %vm188_vm3, 1.0, %v3523_v62  ;;  %v3453_v51 = vtrunc.f32 %v1865_v45  ;;  %v3398_v45 = vcvt.f32.s32 %v3397_v35 }
  0x84   :  { %2979 = vmatprep.mubr.msk.f32.mxu0 %vm282_vm1, %v2513_v63 }
  0x85   :  { %v101_v1 = vpop.permute.xlu1 %100  ;;  %v95_v2 = vpop.permute.xlu0 %94 }
  0x86   :  { %vm187_vm4 = vcmp.eq.s32.totalorder %v3862_v44, %v95_v2  ;;  %1924 = vperm.xlu1 %3508, %v3442_v56   ;;  %1315 = vperm.xlu0 %3507, %v3378_v57   ;;  %vm189_vm5 = vcmp.eq.s32.totalorder %v3862_v44, %v101_v1  ;;  %v1866_v56 = vld [vmem:[%s4506_s0 + $0x338] sm:$0xff]  ;;  %v3454_v1 = vcvt.f32.s32 %v3453_v51  ;;  %v3390_v2 = vcvt.f32.s32 %v3389_v55  ;;  %v1262_v51 = vld [vmem:[%s4506_s0 + $0x260] sm:$0xff] }
  0x87   :  { %v2514_v10 = vsel %vm187_vm4, 1.0, %v3523_v62  ;;  %v2516_v21 = vsel %vm189_vm5, 1.0, %v3523_v62  ;;  %v3455_v0 = vtrunc.f32 %v1866_v56 }
  0x88   :  { %2980 = vmatmul.mubr.msk.f32.vlgmr.msra.gmra.mxu0 %vm282_vm1, %v2514_v10 }
  0x89   :  { %v107_v14 = vpop.permute.xlu1 %106  ;;  %v104_v15 = vpop.permute.xlu0 %103  ;;  %2982 = vmatprep.mubr.msk.f32.mxu0 %vm282_vm1, %v2515_v13  ;;  %3102 = vmatpush3.msk.msra.mxu0 %vm379_vm0, %v3584_v37  ;;  %v3456_v11 = vcvt.f32.s32 %v3455_v0  ;;  %v3392_v13 = vcvt.f32.s32 %v3391_v3 }
  0x8a   :  { %vm190_vm6 = vcmp.eq.s32.totalorder %v3862_v44, %v104_v15  ;;  %1927 = vperm.xlu1 %3508, %v3444_v5   ;;  %1318 = vperm.xlu0 %3507, %v3380_v6   ;;  %vm191_vm7 = vcmp.eq.s32.totalorder %v3862_v44, %v107_v14  ;;  %v3457_v14 = vtrunc.f32 %v1867_v7  ;;  %v3393_v15 = vtrunc.f32 %v1258_v8 }
  0x8b   :  { %v2517_v22 = vsel %vm190_vm6, 1.0, %v3523_v62  ;;  %3103 = vmatprep.subr.mxu0 %v3591_v38  ;;  %v2518_v33 = vsel %vm191_vm7, 1.0, %v3523_v62 }
  0x8c   :  { %2983 = vmatmul.mubr.msk.f32.gmra.mxu0 %vm282_vm1, %v2516_v21  ;;  %v3458_v23 = vcvt.f32.s32 %v3457_v14  ;;  %v3394_v25 = vcvt.f32.s32 %v3393_v15 }
  0x8d   :  { %v113_v37 = vpop.permute.xlu1 %112  ;;  %v110_v26 = vpop.permute.xlu0 %109  ;;  %2985 = vmatprep.mubr.msk.f32.mxu0 %vm282_vm1, %v2517_v22  ;;  %3104 = vmatpush3.msra.mxu0 %v3591_v38  ;;  %v3459_v22 = vtrunc.f32 %v1868_v16 }
  0x8e   :  { %vm192_vm8 = vcmp.eq.s32.totalorder %v3862_v44, %v110_v26  ;;  %1930 = vperm.xlu1 %3508, %v3446_v17   ;;  %1321 = vperm.xlu0 %3507, %v3382_v18   ;;  %vm193_vm9 = vcmp.eq.s32.totalorder %v3862_v44, %v113_v37  ;;  %v3395_v37 = vtrunc.f32 %v1259_v20  ;;  %v1869_v26 = vld [vmem:[%s4506_s0 + $0x350] sm:$0xff]  ;;  %v1265_v20 = vld [vmem:[%s4506_s0 + $0x278] sm:$0xff] }
  0x8f   :  { %v2519_v34 = vsel %vm192_vm8, 1.0, %v3523_v62  ;;  %3105 = vmatprep.subr.mxu0 %v3602_v43  ;;  %v2520_v47 = vsel %vm193_vm9, 1.0, %v3523_v62  ;;  %v3461_v32 = vtrunc.f32 %v1869_v26  ;;  %v1266_v26 = vld [vmem:[%s4506_s0 + $0x280] sm:$0xff] }
  0x90   :  { %2986 = vmatmul.mubr.msk.f32.gmra.mxu0 %vm282_vm1, %v2518_v33  ;;  %v3460_v33 = vcvt.f32.s32 %v3459_v22 }
  0x91   :  { %v119_v38 = vpop.permute.xlu1 %118  ;;  %v116_v36 = vpop.permute.xlu0 %115  ;;  %2988 = vmatprep.mubr.msk.f32.mxu0 %vm282_vm1, %v2519_v34  ;;  %3106 = vmatpush3.msra.mxu0 %v3602_v43  ;;  %v3396_v34 = vcvt.f32.s32 %v3395_v37  ;;  %v3462_v42 = vcvt.f32.s32 %v3461_v32  ;;  %v1875_v37 = vld [vmem:[%s4506_s0 + $0x380] sm:$0xff] }
  0x92   :  { %vm194_vm10 = vcmp.eq.s32.totalorder %v3862_v44, %v116_v36  ;;  %1933 = vperm.xlu1 %3508, %v3448_v28   ;;  %1324 = vperm.xlu0 %3507, %v3384_v29   ;;  %vm195_vm11 = vcmp.eq.s32.totalorder %v3862_v44, %v119_v38 }
  0x93   :  { %v2521_v48 = vsel %vm194_vm10, 1.0, %v3523_v62  ;;  %3107 = vmatprep.subr.mxu0 %v3618_v46  ;;  %v2522_v57 = vsel %vm195_vm11, 1.0, %v3523_v62 }
  0x94   :  { %2989 = vmatmul.mubr.msk.f32.gmra.mxu0 %vm282_vm1, %v2520_v47  ;;  %v3463_v47 = vtrunc.f32 %v1870_v39 }
  0x95   :  { %v125_v43 = vpop.permute.xlu1 %124  ;;  %v122_v50 = vpop.permute.xlu0 %121  ;;  %2991 = vmatprep.mubr.msk.f32.mxu0 %vm282_vm1, %v2521_v48  ;;  %3108 = vmatpush3.msra.mxu0 %v3618_v46 }
  0x96   :  { %vm196_vm12 = vcmp.eq.s32.totalorder %v3862_v44, %v122_v50  ;;  %1936 = vperm.xlu1 %3508, %v3450_v40   ;;  %1327 = vperm.xlu0 %3507, %v3386_v41   ;;  %vm197_vm13 = vcmp.eq.s32.totalorder %v3862_v44, %v125_v43  ;;  %v1261_v40 = vld [vmem:[%s4506_s0 + $0x258] sm:$0xff]  ;;  %v3464_v55 = vcvt.f32.s32 %v3463_v47  ;;  %v1877_v47 = vld [vmem:[%s4506_s0 + $0x390] sm:$0xff] }
  0x97   :  { %v2523_v59 = vsel %vm196_vm12, 1.0, %v3523_v62  ;;  %3109 = vmatprep.subr.mxu0 %v3633_v53  ;;  %v2524_v5 = vsel %vm197_vm13, 1.0, %v3523_v62  ;;  %v3399_v48 = vtrunc.f32 %v1261_v40 }
  0x98   :  { %2992 = vmatmul.mubr.msk.f32.gmra.mxu0 %vm282_vm1, %v2522_v57  ;;  %v3401_v57 = vtrunc.f32 %v1262_v51 }
  0x99   :  { %v131_v46 = vpop.permute.xlu1 %130  ;;  %v128_v63 = vpop.permute.xlu0 %127  ;;  %2994 = vmatprep.mubr.msk.f32.mxu0 %vm282_vm1, %v2523_v59  ;;  %3110 = vmatpush3.msra.mxu0 %v3633_v53  ;;  %v3400_v56 = vcvt.f32.s32 %v3399_v48  ;;  %v1268_v48 = vld [vmem:[%s4506_s0 + $0x290] sm:$0xff] }
  0x9a   :  { %vm198_vm14 = vcmp.eq.s32.totalorder %v3862_v44, %v128_v63  ;;  %1939 = vperm.xlu1 %3508, %v3452_v52   ;;  %1330 = vperm.xlu0 %3507, %v3388_v54   ;;  %vm199_vm15 = vcmp.eq.s32.totalorder %v3862_v44, %v131_v46  ;;  %v3465_v54 = vtrunc.f32 %v1871_v49  ;;  %v1872_v46 = vld [vmem:[%s4506_s0 + $0x368] sm:$0xff] }
  0x9b   :  { %v2525_v6 = vsel %vm198_vm14, 1.0, %v3523_v62  ;;  %3111 = vmatprep.subr.mxu0 %v3641_v58  ;;  %v2526_v17 = vsel %vm199_vm15, 1.0, %v3523_v62  ;;  %v1263_v63 = vld [vmem:[%s4506_s0 + $0x268] sm:$0xff]  ;;  %v3467_v3 = vtrunc.f32 %v1872_v46  ;;  %v1269_v46 = vld [vmem:[%s4506_s0 + $0x298] sm:$0xff] }
  0x9c   :  { %2995 = vmatmul.mubr.msk.f32.gmra.mxu0 %vm282_vm1, %v2524_v5  ;;  %v3403_v5 = vtrunc.f32 %v1263_v63  ;;  %v3509_v63 = vld [vmem:[%s4507_s1 + $0x60] sm:$0x1f] }
  0x9d   :  { %v137_v53 = vpop.permute.xlu1 %136  ;;  %v134_v10 = vpop.permute.xlu0 %133  ;;  %2997 = vmatprep.mubr.msk.f32.mxu0 %vm282_vm1, %v2525_v6  ;;  %3112 = vmatpush3.msra.mxu0 %v3641_v58  ;;  %v1873_v6 = vld [vmem:[%s4506_s0 + $0x370] sm:$0xff] }
  0x9e   :  { %vm200_vm2 = vcmp.eq.s32.totalorder %v3862_v44, %v134_v10  ;;  %1942 = vperm.xlu1 %3508, %v3454_v1   ;;  %1333 = vperm.xlu0 %3507, %v3390_v2   ;;  %vm201_vm3 = vcmp.eq.s32.totalorder %v3862_v44, %v137_v53  ;;  %v3466_v1 = vcvt.f32.s32 %v3465_v54  ;;  %v3402_v2 = vcvt.f32.s32 %v3401_v57  ;;  %v1264_v53 = vld [vmem:[%s4506_s0 + $0x270] sm:$0xff] }
  0x9f   :  { %v2527_v18 = vsel %vm200_vm2, 1.0, %v3523_v62  ;;  %3113 = vmatprep.subr.mxu0 %v3657_v61  ;;  %v2528_v28 = vsel %vm201_vm3, 1.0, %v3523_v62  ;;  %v3404_v14 = vcvt.f32.s32 %v3403_v5  ;;  %v3405_v15 = vtrunc.f32 %v1264_v53 }
  0xa0   :  { %2998 = vmatmul.mubr.msk.f32.gmra.mxu0 %vm282_vm1, %v2526_v17  ;;  %v3413_v54 = vtrunc.f32 %v1268_v48 }
  0xa1   :  { %v143_v58 = vpop.permute.xlu1 %142  ;;  %v140_v21 = vpop.permute.xlu0 %139  ;;  %3000 = vmatprep.mubr.msk.f32.mxu0 %vm282_vm1, %v2527_v18  ;;  %3114 = vmatpush3.msra.mxu0 %v3657_v61  ;;  %v1874_v18 = vld [vmem:[%s4506_s0 + $0x378] sm:$0xff]  ;;  %v3406_v22 = vcvt.f32.s32 %v3405_v15 }
  0xa2   :  { %vm202_vm4 = vcmp.eq.s32.totalorder %v3862_v44, %v140_v21  ;;  %1945 = vperm.xlu1 %3508, %v3456_v11   ;;  %1336 = vperm.xlu0 %3507, %v3392_v13   ;;  %vm203_vm5 = vcmp.eq.s32.totalorder %v3862_v44, %v143_v58  ;;  %v3469_v11 = vtrunc.f32 %v1873_v6  ;;  %v3468_v13 = vcvt.f32.s32 %v3467_v3 }
  0xa3   :  { %v2529_v29 = vsel %vm202_vm4, 1.0, %v3523_v62  ;;  %3115 = vmatprep.subr.mxu0 %v3672_v4  ;;  %v2530_v38 = vsel %vm203_vm5, 1.0, %v3523_v62  ;;  %v3414_v3 = vcvt.f32.s32 %v3413_v54  ;;  %v3415_v6 = vtrunc.f32 %v1269_v46 }
  0xa4   :  { %3001 = vmatmul.mubr.msk.f32.gmra.mxu0 %vm282_vm1, %v2528_v28  ;;  %v3470_v21 = vcvt.f32.s32 %v3469_v11 }
  0xa5   :  { %v149_v61 = vpop.permute.xlu1 %148  ;;  %v146_v31 = vpop.permute.xlu0 %145  ;;  %3003 = vmatprep.mubr.msk.f32.mxu0 %vm282_vm1, %v2529_v29  ;;  %3116 = vmatpush3.msra.mxu0 %v3672_v4 }
  0xa6   :  { %vm204_vm6 = vcmp.eq.s32.totalorder %v3862_v44, %v146_v31  ;;  %1948 = vperm.xlu1 %3508, %v3458_v23   ;;  %1339 = vperm.xlu0 %3507, %v3394_v25   ;;  %vm205_vm7 = vcmp.eq.s32.totalorder %v3862_v44, %v149_v61  ;;  %v3471_v23 = vtrunc.f32 %v1874_v18  ;;  %v3407_v25 = vtrunc.f32 %v1265_v20 }
  0xa7   :  { %v2531_v36 = vsel %vm204_vm6, 1.0, %v3523_v62  ;;  %3117 = vmatprep.subr.mxu0 %v3680_v9  ;;  %v2532_v43 = vsel %vm205_vm7, 1.0, %v3523_v62  ;;  %v3473_v61 = vtrunc.f32 %v1875_v37  ;;  %v3409_v31 = vtrunc.f32 %v1266_v26 }
  0xa8   :  { %3004 = vmatmul.mubr.msk.f32.gmra.mxu0 %vm282_vm1, %v2530_v38  ;;  %v3472_v32 = vcvt.f32.s32 %v3471_v23  ;;  %v1876_v38 = vld [vmem:[%s4506_s0 + $0x388] sm:$0xff] }
  0xa9   :  { %v155_v4 = vpop.permute.xlu1 %154  ;;  %v152_v41 = vpop.permute.xlu0 %151  ;;  %3006 = vmatprep.mubr.msk.f32.mxu0 %vm282_vm1, %v2531_v36  ;;  %3118 = vmatpush3.msra.mxu0 %v3680_v9  ;;  %v1267_v36 = vld [vmem:[%s4506_s0 + $0x288] sm:$0xff] }
  0xaa   :  { %vm206_vm8 = vcmp.eq.s32.totalorder %v3862_v44, %v152_v41  ;;  %1951 = vperm.xlu1 %3508, %v3460_v33   ;;  %1342 = vperm.xlu0 %3507, %v3396_v34   ;;  %vm207_vm9 = vcmp.eq.s32.totalorder %v3862_v44, %v155_v4  ;;  %v3408_v33 = vcvt.f32.s32 %v3407_v25  ;;  %v3474_v4 = vcvt.f32.s32 %v3473_v61 }
  0xab   :  { %v2533_v50 = vsel %vm206_vm8, 1.0, %v3523_v62  ;;  %3119 = vmatprep.subr.mxu0 %v3696_v12  ;;  %v2534_v59 = vsel %vm207_vm9, 1.0, %v3523_v62  ;;  %v3410_v41 = vcvt.f32.s32 %v3409_v31  ;;  %v3513_v31 = vld [vmem:[%s4507_s1 + $0x40] sm:$0xff] }
  0xac   :  { %3007 = vmatmul.mubr.msk.f32.gmra.mxu0 %vm282_vm1, %v2532_v43 }
  0xad   :  { %v161_v9 = vpop.permute.xlu1 %160  ;;  %v158_v52 = vpop.permute.xlu0 %157  ;;  %3009 = vmatprep.mubr.msk.f32.mxu0 %vm282_vm1, %v2533_v50  ;;  %3120 = vmatpush3.msra.mxu0 %v3696_v12 }
  0xae   :  { %vm208_vm10 = vcmp.eq.s32.totalorder %v3862_v44, %v158_v52  ;;  %1954 = vperm.xlu1 %3508, %v3462_v42   ;;  %1345 = vperm.xlu0 %3507, %v3398_v45   ;;  %vm209_vm11 = vcmp.eq.s32.totalorder %v3862_v44, %v161_v9  ;;  %v3475_v42 = vtrunc.f32 %v1876_v38  ;;  %v3411_v45 = vtrunc.f32 %v1267_v36 }
  0xaf   :  { %v2535_v60 = vsel %vm208_vm10, 1.0, %v3523_v62  ;;  %3121 = vmatprep.subr.mxu0 %v3711_v19  ;;  %v2536_v7 = vsel %vm209_vm11, 1.0, %v3523_v62  ;;  %v3477_v52 = vtrunc.f32 %v1877_v47 }
  0xb0   :  { %3010 = vmatmul.mubr.msk.f32.gmra.mxu0 %vm282_vm1, %v2534_v59 }
  0xb1   :  { %v167_v12 = vpop.permute.xlu1 %166  ;;  %v164_v0 = vpop.permute.xlu0 %163  ;;  %3012 = vmatprep.mubr.msk.f32.mxu0 %vm282_vm1, %v2535_v60  ;;  %3122 = vmatpush3.msra.mxu0 %v3711_v19  ;;  %v1878_v60 = vld [vmem:[%s4506_s0 + $0x398] sm:$0xff] }
  0xb2   :  { %vm210_vm12 = vcmp.eq.s32.totalorder %v3862_v44, %v164_v0  ;;  %1957 = vperm.xlu1 %3508, %v3464_v55   ;;  %1348 = vperm.xlu0 %3507, %v3400_v56   ;;  %vm211_vm13 = vcmp.eq.s32.totalorder %v3862_v44, %v167_v12  ;;  %v3476_v55 = vcvt.f32.s32 %v3475_v42  ;;  %v3412_v56 = vcvt.f32.s32 %v3411_v45  ;;  %v3510_v12 = vld [vmem:[%s4507_s1 + $0x58] sm:$0xff] }
  0xb3   :  { %v2537_v8 = vsel %vm210_vm12, 1.0, %v3523_v62  ;;  %3123 = vmatprep.subr.mxu0 %v3719_v24  ;;  %v2538_v16 = vsel %vm211_vm13, 1.0, %v3523_v62  ;;  %v3479_v5 = vtrunc.f32 %v1878_v60  ;;  %v3514_v42 = vld [vmem:[%s4507_s1 + $0x38] sm:$0xff] }
  0xb4   :  { %3013 = vmatmul.mubr.msk.f32.gmra.mxu0 %vm282_vm1, %v2536_v7  ;;  %v1879_v7 = vld [vmem:[%s4506_s0 + $0x3a0] sm:$0xff] }
  0xb5   :  { %v173_v19 = vpop.permute.xlu1 %172  ;;  %v170_v10 = vpop.permute.xlu0 %169  ;;  %3015 = vmatprep.mubr.msk.f32.mxu0 %vm282_vm1, %v2537_v8  ;;  %3124 = vmatpush3.msra.mxu0 %v3719_v24  ;;  %v1270_v8 = vld [vmem:[%s4506_s0 + $0x2a0] sm:$0xff] }
  0xb6   :  { %vm212_vm14 = vcmp.eq.s32.totalorder %v3862_v44, %v170_v10  ;;  %1960 = vperm.xlu1 %3508, %v3466_v1   ;;  %1351 = vperm.xlu0 %3507, %v3402_v2   ;;  %vm213_vm15 = vcmp.eq.s32.totalorder %v3862_v44, %v173_v19  ;;  %v3478_v2 = vcvt.f32.s32 %v3477_v52  ;;  %v3511_v10 = vld [vmem:[%s4507_s1 + $0x50] sm:$0xff]  ;;  %v3417_v15 = vtrunc.f32 %v1270_v8 }
  0xb7   :  { %v2539_v17 = vsel %vm212_vm14, 1.0, %v3523_v62  ;;  %3125 = vmatprep.subr.mxu0 %v3735_v27  ;;  %v2540_v28 = vsel %vm213_vm15, 1.0, %v3523_v62 }
  0xb8   :  { %3016 = vmatmul.mubr.msk.f32.gmra.mxu0 %vm282_vm1, %v2538_v16  ;;  %v3480_v16 = vcvt.f32.s32 %v3479_v5  ;;  %v3418_v37 = vcvt.f32.s32 %v3417_v15  ;;  %v3517_v15 = vld [vmem:[%s4507_s1 + $0x20] sm:$0xff] }
  0xb9   :  { %v179_v24 = vpop.permute.xlu1 %178  ;;  %v176_v58 = vpop.permute.xlu0 %175  ;;  %3018 = vmatprep.mubr.msk.f32.mxu0 %vm282_vm1, %v2539_v17  ;;  %3126 = vmatpush3.msra.mxu0 %v3735_v27  ;;  %v3416_v17 = vcvt.f32.s32 %v3415_v6 }
  0xba   :  { %vm214_vm2 = vcmp.eq.s32.totalorder %v3862_v44, %v176_v58  ;;  %1963 = vperm.xlu1 %3508, %v3468_v13   ;;  %1354 = vperm.xlu0 %3507, %v3404_v14   ;;  %vm215_vm3 = vcmp.eq.s32.totalorder %v3862_v44, %v179_v24  ;;  %v3481_v14 = vtrunc.f32 %v1879_v7  ;;  %v1880_v24 = vld [vmem:[%s4506_s0 + $0x3a8] sm:$0xff] }
  0xbb   :  { %v2541_v29 = vsel %vm214_vm2, 1.0, %v3523_v62  ;;  %v2542_v34 = vsel %vm215_vm3, 1.0, %v3523_v62  ;;  %v1271_v58 = vld [vmem:[%s4506_s0 + $0x2a8] sm:$0xff]  ;;  %v3483_v26 = vtrunc.f32 %v1880_v24 }
  0xbc   :  { %3019 = vmatmul.mubr.msk.f32.gmra.mxu0 %vm282_vm1, %v2540_v28  ;;  %v3482_v25 = vcvt.f32.s32 %v3481_v14  ;;  %v3419_v28 = vtrunc.f32 %v1271_v58 }
  0xbd   :  { %v185_v27 = vpop.permute.xlu1 %184  ;;  %v182_v30 = vpop.permute.xlu0 %181  ;;  %3021 = vmatprep.mubr.msk.f32.mxu0 %vm282_vm1, %v2541_v29  ;;  %v1881_v29 = vld [vmem:[%s4506_s0 + $0x3b0] sm:$0xff]  ;;  %v3484_v38 = vcvt.f32.s32 %v3483_v26 }
  0xbe   :  { %vm216_vm4 = vcmp.eq.s32.totalorder %v3862_v44, %v182_v30  ;;  %1966 = vperm.xlu1 %3508, %v3470_v21   ;;  %1357 = vperm.xlu0 %3507, %v3406_v22   ;;  %vm217_vm5 = vcmp.eq.s32.totalorder %v3862_v44, %v185_v27  ;;  %v3512_v21 = vld [vmem:[%s4507_s1 + $0x48] sm:$0xff]  ;;  %v1272_v27 = vld [vmem:[%s4506_s0 + $0x2b0] sm:$0xff]  ;;  %v3420_v36 = vcvt.f32.s32 %v3419_v28 }
  0xbf   :  { %v2543_v35 = vsel %vm216_vm4, 1.0, %v3523_v62  ;;  %v2544_v49 = vsel %vm217_vm5, 1.0, %v3523_v62 }
  0xc0   :  { %3022 = vmatmul.mubr.msk.f32.gmra.mxu0 %vm282_vm1, %v2542_v34  ;;  %v3485_v34 = vtrunc.f32 %v1881_v29 }
  0xc1   :  { %v710_v39 = vpop.permute.xlu1 %709  ;;  %v707_v40 = vpop.permute.xlu0 %706  ;;  %3024 = vmatprep.mubr.msk.f32.mxu0 %vm282_vm1, %v2543_v35  ;;  %v3421_v35 = vtrunc.f32 %v1272_v27 }
  0xc2   :  { %vm802_vm6 = vcmp.eq.s32.totalorder %v3862_v44, %v710_v39  ;;  %vm801_vm7 = vcmp.eq.s32.totalorder %v3862_v44, %v707_v40  ;;  %1969 = vperm.xlu1 %3508, %v3472_v32   ;;  %1360 = vperm.xlu0 %3507, %v3408_v33   ;;  %v3486_v48 = vcvt.f32.s32 %v3485_v34 }
  0xc3   :  { %v2579_v43 = vsel %vm802_vm6, 1.0, %v3523_v62  ;;  %v2578_v50 = vsel %vm801_vm7, 1.0, %v3523_v62 }
  0xc4   :  { %3025 = vmatmul.mubr.msk.f32.gmra.mxu0 %vm282_vm1, %v2544_v49  ;;  %3053 = vmatprep.mubr.msk.f32.mxu1 %vm282_vm1, %v2578_v50  ;;  %v3422_v49 = vcvt.f32.s32 %v3421_v35  ;;  %v3519_v35 = vld [vmem:[%s4507_s1 + $0x10] sm:$0xff] }
  0xc5   :  { %v716_v51 = vpop.permute.xlu1 %715  ;;  %v713_v9 = vpop.permute.xlu0 %712  ;;  %3054 = vmatmul.mubr.msk.f32.vlgmr.msra.gmra.mxu1 %vm282_vm1, %v2579_v43 }
  0xc6   :  { %vm804_vm8 = vcmp.eq.s32.totalorder %v3862_v44, %v716_v51  ;;  %vm803_vm9 = vcmp.eq.s32.totalorder %v3862_v44, %v713_v9  ;;  %1972 = vperm.xlu1 %3508, %v3474_v4   ;;  %1363 = vperm.xlu0 %3507, %v3410_v41   ;;  %v1882_v4 = vld [vmem:[%s4506_s0 + $0x3b8] sm:$0xff]  ;;  %v1883_v51 = vld [vmem:[%s4506_s0 + $0x3c0] sm:$0xff] }
  0xc7   :  { %v2581_v57 = vsel %vm804_vm8, 1.0, %v3523_v62  ;;  %v2580_v59 = vsel %vm803_vm9, 1.0, %v3523_v62  ;;  %3176 = vmatpush3.msk.msra.mxu1 %vm379_vm0, %v3509_v63  ;;  %v1273_v41 = vld [vmem:[%s4506_s0 + $0x2b8] sm:$0xff]  ;;  %v3487_v43 = vtrunc.f32 %v1882_v4  ;;  %v1274_v9 = vld [vmem:[%s4506_s0 + $0x2c0] sm:$0xff] }
  0xc8   :  { %3056 = vmatprep.mubr.msk.f32.mxu1 %vm282_vm1, %v2580_v59  ;;  %3177 = vmatprep.subr.mxu1 %v3510_v12  ;;  %v3423_v50 = vtrunc.f32 %v1273_v41  ;;  %v3489_v59 = vtrunc.f32 %v1883_v51  ;;  %v3425_v60 = vtrunc.f32 %v1274_v9 }
  0xc9   :  { %v722_v0 = vpop.permute.xlu1 %721  ;;  %v719_v1 = vpop.permute.xlu0 %718  ;;  %3057 = vmatmul.mubr.msk.f32.gmra.mxu1 %vm282_vm1, %v2581_v57  ;;  %v3488_v46 = vcvt.f32.s32 %v3487_v43 }
  0xca   :  { %vm806_vm10 = vcmp.eq.s32.totalorder %v3862_v44, %v722_v0  ;;  %vm805_vm11 = vcmp.eq.s32.totalorder %v3862_v44, %v719_v1  ;;  %1975 = vperm.xlu1 %3508, %v3476_v55   ;;  %1366 = vperm.xlu0 %3507, %v3412_v56   ;;  %v3515_v55 = vld [vmem:[%s4507_s1 + $0x30] sm:$0xff]  ;;  %v3424_v63 = vcvt.f32.s32 %v3423_v50  ;;  %v1884_v1 = vld [vmem:[%s4506_s0 + $0x3c8] sm:$0xff]  ;;  %v3490_v7 = vcvt.f32.s32 %v3489_v59 }
  0xcb   :  { %v2583_v53 = vsel %vm806_vm10, 1.0, %v3523_v62  ;;  %v2582_v19 = vsel %vm805_vm11, 1.0, %v3523_v62  ;;  %3178 = vmatpush3.msra.mxu1 %v3510_v12  ;;  %v3426_v8 = vcvt.f32.s32 %v3425_v60  ;;  %v3521_v60 = vld [vmem:[%s4507_s1] sm:$0xff] }
  0xcc   :  { %3059 = vmatprep.mubr.msk.f32.mxu1 %vm282_vm1, %v2582_v19  ;;  %3179 = vmatprep.subr.mxu1 %v3511_v10 }
  0xcd   :  { %v728_v11 = vpop.permute.xlu1 %727  ;;  %v725_v13 = vpop.permute.xlu0 %724  ;;  %3060 = vmatmul.mubr.msk.f32.gmra.mxu1 %vm282_vm1, %v2583_v53  ;;  %v3491_v53 = vtrunc.f32 %v1884_v1 }
  0xce   :  { %vm808_vm0 = vcmp.eq.s32.totalorder %v3862_v44, %v728_v11  ;;  %vm807_vm12 = vcmp.eq.s32.totalorder %v3862_v44, %v725_v13  ;;  %1978 = vperm.xlu1 %3508, %v3478_v2   ;;  %1369 = vperm.xlu0 %3507, %v3414_v3   ;;  %v1275_v2 = vld [vmem:[%s4506_s0 + $0x2c8] sm:$0xff]  ;;  %v1276_v11 = vld [vmem:[%s4506_s0 + $0x2d0] sm:$0xff] }
  0xcf   :  { %v2585_v18 = vsel %vm808_vm0, 1.0, %v3523_v62  ;;  %v2584_v20 = vsel %vm807_vm12, 1.0, %v3523_v62  ;;  %3180 = vmatpush3.msra.mxu1 %v3511_v10  ;;  %v3516_v3 = vld [vmem:[%s4507_s1 + $0x28] sm:$0xff]  ;;  %v3427_v19 = vtrunc.f32 %v1275_v2  ;;  %v1885_v10 = vld [vmem:[%s4506_s0 + $0x3d0] sm:$0xff]  ;;  %v3492_v24 = vcvt.f32.s32 %v3491_v53 }
  0xd0   :  { %3062 = vmatprep.mubr.msk.f32.mxu1 %vm282_vm1, %v2584_v20  ;;  %3181 = vmatprep.subr.mxu1 %v3512_v21  ;;  %v3429_v20 = vtrunc.f32 %v1276_v11 }
  0xd1   :  { %v734_v22 = vpop.permute.xlu1 %733  ;;  %v731_v23 = vpop.permute.xlu0 %730  ;;  %3063 = vmatmul.mubr.msk.f32.gmra.mxu1 %vm282_vm1, %v2585_v18  ;;  %v3493_v18 = vtrunc.f32 %v1885_v10  ;;  %v3428_v58 = vcvt.f32.s32 %v3427_v19 }
  0xd2   :  { %vm810_vm13 = vcmp.eq.s32.totalorder %v3862_v44, %v734_v22  ;;  %vm809_vm14 = vcmp.eq.s32.totalorder %v3862_v44, %v731_v23  ;;  %1981 = vperm.xlu1 %3508, %v3480_v16   ;;  %1372 = vperm.xlu0 %3507, %v3416_v17   ;;  %v1886_v23 = vld [vmem:[%s4506_s0 + $0x3d8] sm:$0xff]  ;;  %v3430_v27 = vcvt.f32.s32 %v3429_v20 }
  0xd3   :  { %v2587_v30 = vsel %vm810_vm13, 1.0, %v3523_v62  ;;  %v2586_v61 = vsel %vm809_vm14, 1.0, %v3523_v62  ;;  %3182 = vmatpush3.msra.mxu1 %v3512_v21  ;;  %v3494_v29 = vcvt.f32.s32 %v3493_v18 }
  0xd4   :  { %3065 = vmatprep.mubr.msk.f32.mxu1 %vm282_vm1, %v2586_v61  ;;  %3183 = vmatprep.subr.mxu1 %v3513_v31 }
  0xd5   :  { %v740_v32 = vpop.permute.xlu1 %739  ;;  %v737_v33 = vpop.permute.xlu0 %736  ;;  %3066 = vmatmul.mubr.msk.f32.gmra.mxu1 %vm282_vm1, %v2587_v30  ;;  %v3495_v30 = vtrunc.f32 %v1886_v23 }
  0xd6   :  { %vm812_vm15 = vcmp.eq.s32.totalorder %v3862_v44, %v740_v32  ;;  %vm811_vm2 = vcmp.eq.s32.totalorder %v3862_v44, %v737_v33  ;;  %1984 = vperm.xlu1 %3508, %v3482_v25   ;;  %1375 = vperm.xlu0 %3507, %v3418_v37   ;;  %v1277_v25 = vld [vmem:[%s4506_s0 + $0x2d8] sm:$0xff]  ;;  %v1278_v32 = vld [vmem:[%s4506_s0 + $0x2e0] sm:$0xff] }
  0xd7   :  { %v2589_v39 = vsel %vm812_vm15, 1.0, %v3523_v62  ;;  %v2588_v40 = vsel %vm811_vm2, 1.0, %v3523_v62  ;;  %3184 = vmatpush3.msra.mxu1 %v3513_v31  ;;  %v3518_v37 = vld [vmem:[%s4507_s1 + $0x18] sm:$0xff]  ;;  %v3431_v61 = vtrunc.f32 %v1277_v25  ;;  %v1887_v31 = vld [vmem:[%s4506_s0 + $0x3e0] sm:$0xff]  ;;  %v3496_v4 = vcvt.f32.s32 %v3495_v30 }
  0xd8   :  { %3068 = vmatprep.mubr.msk.f32.mxu1 %vm282_vm1, %v2588_v40  ;;  %3185 = vmatprep.subr.mxu1 %v3514_v42  ;;  %v3433_v40 = vtrunc.f32 %v1278_v32 }
  0xd9   :  { %v746_v45 = vpop.permute.xlu1 %745  ;;  %v743_v47 = vpop.permute.xlu0 %742  ;;  %3069 = vmatmul.mubr.msk.f32.gmra.mxu1 %vm282_vm1, %v2589_v39  ;;  %v3497_v39 = vtrunc.f32 %v1887_v31  ;;  %v3432_v41 = vcvt.f32.s32 %v3431_v61 }
  0xda   :  { %vm814_vm3 = vcmp.eq.s32.totalorder %v3862_v44, %v746_v45  ;;  %vm813_vm4 = vcmp.eq.s32.totalorder %v3862_v44, %v743_v47  ;;  %1987 = vperm.xlu1 %3508, %v3484_v38   ;;  %1378 = vperm.xlu0 %3507, %v3420_v36   ;;  %v1888_v47 = vld [vmem:[%s4506_s0 + $0x3e8] sm:$0xff]  ;;  %v3434_v9 = vcvt.f32.s32 %v3433_v40 }
  0xdb   :  { %v2591_v52 = vsel %vm814_vm3, 1.0, %v3523_v62  ;;  %v2590_v54 = vsel %vm813_vm4, 1.0, %v3523_v62  ;;  %3186 = vmatpush3.msra.mxu1 %v3514_v42  ;;  %v3498_v51 = vcvt.f32.s32 %v3497_v39 }
  0xdc   :  { %3071 = vmatprep.mubr.msk.f32.mxu1 %vm282_vm1, %v2590_v54  ;;  %3187 = vmatprep.subr.mxu1 %v3515_v55 }
  0xdd   :  { %v752_v56 = vpop.permute.xlu1 %751  ;;  %v749_v57 = vpop.permute.xlu0 %748  ;;  %3072 = vmatmul.mubr.msk.f32.gmra.mxu1 %vm282_vm1, %v2591_v52  ;;  %v3499_v52 = vtrunc.f32 %v1888_v47 }
  0xde   :  { %vm816_vm5 = vcmp.eq.s32.totalorder %v3862_v44, %v752_v56  ;;  %vm815_vm6 = vcmp.eq.s32.totalorder %v3862_v44, %v749_v57  ;;  %1990 = vperm.xlu1 %3508, %v3486_v48   ;;  %1381 = vperm.xlu0 %3507, %v3422_v49   ;;  %v1279_v48 = vld [vmem:[%s4506_s0 + $0x2e8] sm:$0xff]  ;;  %v1280_v56 = vld [vmem:[%s4506_s0 + $0x2f0] sm:$0xff] }
  0xdf   :  { %v2593_v12 = vsel %vm816_vm5, 1.0, %v3523_v62  ;;  %v2592_v0 = vsel %vm815_vm6, 1.0, %v3523_v62  ;;  %3188 = vmatpush3.msra.mxu1 %v3515_v55  ;;  %v3520_v49 = vld [vmem:[%s4507_s1 + $0x8] sm:$0xff]  ;;  %v3435_v54 = vtrunc.f32 %v1279_v48  ;;  %v1889_v55 = vld [vmem:[%s4506_s0 + $0x3f0] sm:$0xff]  ;;  %v3500_v1 = vcvt.f32.s32 %v3499_v52 }
  0xe0   :  { %3074 = vmatprep.mubr.msk.f32.mxu1 %vm282_vm1, %v2592_v0  ;;  %3189 = vmatprep.subr.mxu1 %v3516_v3  ;;  %v3437_v0 = vtrunc.f32 %v1280_v56 }
  0xe1   :  { %v758_v5 = vpop.permute.xlu1 %757  ;;  %v755_v6 = vpop.permute.xlu0 %754  ;;  %3075 = vmatmul.mubr.msk.f32.gmra.mxu1 %vm282_vm1, %v2593_v12  ;;  %v3501_v12 = vtrunc.f32 %v1889_v55  ;;  %v3436_v2 = vcvt.f32.s32 %v3435_v54 }
  0xe2   :  { %vm818_vm7 = vcmp.eq.s32.totalorder %v3862_v44, %v758_v5  ;;  %vm817_vm8 = vcmp.eq.s32.totalorder %v3862_v44, %v755_v6  ;;  %1993 = vperm.xlu1 %3508, %v3488_v46   ;;  %1384 = vperm.xlu0 %3507, %v3424_v63   ;;  %v1890_v6 = vld [vmem:[%s4506_s0 + $0x3f8] sm:$0xff]  ;;  %v3438_v10 = vcvt.f32.s32 %v3437_v0 }
  0xe3   :  { %v2595_v13 = vsel %vm818_vm7, 1.0, %v3523_v62  ;;  %v2594_v14 = vsel %vm817_vm8, 1.0, %v3523_v62  ;;  %3190 = vmatpush3.msra.mxu1 %v3516_v3  ;;  %v3502_v19 = vcvt.f32.s32 %v3501_v12  ;;  %v3503_v11 = vtrunc.f32 %v1890_v6 }
  0xe4   :  { %3077 = vmatprep.mubr.msk.f32.mxu1 %vm282_vm1, %v2594_v14  ;;  %3191 = vmatprep.subr.mxu1 %v3517_v15 }
  0xe5   :  { %v764_v16 = vpop.permute.xlu1 %763  ;;  %v761_v17 = vpop.permute.xlu0 %760  ;;  %3078 = vmatmul.mubr.msk.f32.gmra.mxu1 %vm282_vm1, %v2595_v13  ;;  %v3504_v18 = vcvt.f32.s32 %v3503_v11 }
  0xe6   :  { %vm820_vm9 = vcmp.eq.s32.totalorder %v3862_v44, %v764_v16  ;;  %vm819_vm10 = vcmp.eq.s32.totalorder %v3862_v44, %v761_v17  ;;  %1996 = vperm.xlu1 %3508, %v3490_v7   ;;  %1387 = vperm.xlu0 %3507, %v3426_v8   ;;  %v1281_v7 = vld [vmem:[%s4506_s0 + $0x2f8] sm:$0xff] }
  0xe7   :  { %v2597_v21 = vsel %vm820_vm9, 1.0, %v3523_v62  ;;  %v2596_v22 = vsel %vm819_vm10, 1.0, %v3523_v62  ;;  %3192 = vmatpush3.msra.mxu1 %v3517_v15  ;;  %v3439_v13 = vtrunc.f32 %v1281_v7 }
  0xe8   :  { %3080 = vmatprep.mubr.msk.f32.mxu1 %vm282_vm1, %v2596_v22  ;;  %3193 = vmatprep.subr.mxu1 %v3518_v37 }
  0xe9   :  { %v770_v26 = vpop.permute.xlu1 %769  ;;  %v767_v28 = vpop.permute.xlu0 %766  ;;  %3081 = vmatmul.mubr.msk.f32.gmra.mxu1 %vm282_vm1, %v2597_v21  ;;  %v3440_v20 = vcvt.f32.s32 %v3439_v13 }
  0xea   :  { %vm822_vm11 = vcmp.eq.s32.totalorder %v3862_v44, %v770_v26  ;;  %vm821_vm0 = vcmp.eq.s32.totalorder %v3862_v44, %v767_v28  ;;  %1999 = vperm.xlu1 %3508, %v3492_v24   ;;  %1390 = vperm.xlu0 %3507, %v3428_v58  }
  0xeb   :  { %v2599_v33 = vsel %vm822_vm11, 1.0, %v3523_v62  ;;  %v2598_v34 = vsel %vm821_vm0, 1.0, %v3523_v62  ;;  %3194 = vmatpush3.msra.mxu1 %v3518_v37 }
  0xec   :  { %3083 = vmatprep.mubr.msk.f32.mxu1 %vm282_vm1, %v2598_v34  ;;  %3195 = vmatprep.subr.mxu1 %v3519_v35 }
  0xed   :  { %v776_v38 = vpop.permute.xlu1 %775  ;;  %v773_v36 = vpop.permute.xlu0 %772  ;;  %3084 = vmatmul.mubr.msk.f32.gmra.mxu1 %vm282_vm1, %v2599_v33 }
  0xee   :  { %vm824_vm12 = vcmp.eq.s32.totalorder %v3862_v44, %v776_v38  ;;  %vm823_vm13 = vcmp.eq.s32.totalorder %v3862_v44, %v773_v36  ;;  %2002 = vperm.xlu1 %3508, %v3494_v29   ;;  %1393 = vperm.xlu0 %3507, %v3430_v27  }
  0xef   :  { %v2601_v42 = vsel %vm824_vm12, 1.0, %v3523_v62  ;;  %v2600_v45 = vsel %vm823_vm13, 1.0, %v3523_v62  ;;  %3196 = vmatpush3.msra.mxu1 %v3519_v35 }
  0xf0   :  { %3086 = vmatprep.mubr.msk.f32.mxu1 %vm282_vm1, %v2600_v45  ;;  %3197 = vmatprep.subr.mxu1 %v3520_v49 }
  0xf1   :  { %v782_v43 = vpop.permute.xlu1 %781  ;;  %v779_v50 = vpop.permute.xlu0 %778  ;;  %3087 = vmatmul.mubr.msk.f32.gmra.mxu1 %vm282_vm1, %v2601_v42 }
  0xf2   :  { %vm826_vm14 = vcmp.eq.s32.totalorder %v3862_v44, %v782_v43  ;;  %vm825_vm15 = vcmp.eq.s32.totalorder %v3862_v44, %v779_v50  ;;  %2005 = vperm.xlu1 %3508, %v3496_v4   ;;  %1396 = vperm.xlu0 %3507, %v3432_v41  }
  0xf3   :  { %v2603_v57 = vsel %vm826_vm14, 1.0, %v3523_v62  ;;  %v2602_v59 = vsel %vm825_vm15, 1.0, %v3523_v62  ;;  %3198 = vmatpush3.msra.mxu1 %v3520_v49 }
  0xf4   :  { %3089 = vmatprep.mubr.msk.f32.mxu1 %vm282_vm1, %v2602_v59  ;;  %3199 = vmatprep.subr.mxu1 %v3521_v60 }
  0xf5   :  { %v788_v46 = vpop.permute.xlu1 %787  ;;  %v785_v63 = vpop.permute.xlu0 %784  ;;  %3090 = vmatmul.mubr.msk.f32.gmra.mxu1 %vm282_vm1, %v2603_v57 }
  0xf6   :  { %vm828_vm2 = vcmp.eq.s32.totalorder %v3862_v44, %v788_v46  ;;  %vm827_vm3 = vcmp.eq.s32.totalorder %v3862_v44, %v785_v63  ;;  %2008 = vperm.xlu1 %3508, %v3498_v51   ;;  %1399 = vperm.xlu0 %3507, %v3434_v9  }
  0xf7   :  { %v2605_v3 = vsel %vm828_vm2, 1.0, %v3523_v62  ;;  %v2604_v5 = vsel %vm827_vm3, 1.0, %v3523_v62  ;;  %3200 = vmatpush3.msra.mxu1 %v3521_v60 }
  0xf8   :  { %3092 = vmatprep.mubr.msk.f32.mxu1 %vm282_vm1, %v2604_v5 }
  0xf9   :  { %v794_v8 = vpop.permute.xlu1 %793  ;;  %v791_v53 = vpop.permute.xlu0 %790  ;;  %3093 = vmatmul.mubr.msk.f32.gmra.mxu1 %vm282_vm1, %v2605_v3 }
  0xfa   :  { %vm830_vm4 = vcmp.eq.s32.totalorder %v3862_v44, %v794_v8  ;;  %vm829_vm5 = vcmp.eq.s32.totalorder %v3862_v44, %v791_v53  ;;  %2011 = vperm.xlu1 %3508, %v3500_v1   ;;  %1402 = vperm.xlu0 %3507, %v3436_v2  }
  0xfb   :  { %v2607_v14 = vsel %vm830_vm4, 1.0, %v3523_v62  ;;  %v2606_v15 = vsel %vm829_vm5, 1.0, %v3523_v62 }
  0xfc   :  { %3095 = vmatprep.mubr.msk.f32.mxu1 %vm282_vm1, %v2606_v15 }
  0xfd   :  { %v800_v16 = vpop.permute.xlu1 %799  ;;  %v797_v17 = vpop.permute.xlu0 %796  ;;  %3096 = vmatmul.mubr.msk.f32.gmra.mxu1 %vm282_vm1, %v2607_v14 }
  0xfe   :  { %vm832_vm6 = vcmp.eq.s32.totalorder %v3862_v44, %v800_v16  ;;  %vm831_vm7 = vcmp.eq.s32.totalorder %v3862_v44, %v797_v17  ;;  %2014 = vperm.xlu1 %3508, %v3502_v19   ;;  %1405 = vperm.xlu0 %3507, %v3438_v10  }
  0xff   :  { %v2609_v24 = vsel %vm832_vm6, 1.0, %v3523_v62  ;;  %v2608_v58 = vsel %vm831_vm7, 1.0, %v3523_v62 }
 0x100   :  { %3098 = vmatprep.mubr.msk.f32.mxu1 %vm282_vm1, %v2608_v58 }
 0x101   :  { %v1925_v21 = vpop.permute.xlu1 %1924  ;;  %v1316_v22 = vpop.permute.xlu0 %1315  ;;  %3099 = vmatmul.mubr.msk.f32.gmra.mxu1 %vm282_vm1, %v2609_v24 }
 0x102   :  { %vm2019_vm8 = vcmp.eq.s32.totalorder %v3862_v44, %v1925_v21  ;;  %vm1410_vm9 = vcmp.eq.s32.totalorder %v3862_v44, %v1316_v22  ;;  %2017 = vperm.xlu1 %3508, %v3504_v18   ;;  %1408 = vperm.xlu0 %3507, %v3440_v20  }
 0x103   :  { %v2708_v23 = vsel %vm2019_vm8, 1.0, %v3523_v62  ;;  %v2643_v25 = vsel %vm1410_vm9, 1.0, %v3523_v62 }
 0x104   :  { %3127 = vmatprep.mubr.msk.f32.mxu0 %vm282_vm1, %v2643_v25  ;;  %3201 = vmatprep.mubr.msk.f32.mxu1 %vm282_vm1, %v2708_v23 }
 0x105   :  { %v1928_v37 = vpop.permute.xlu1 %1927  ;;  %v1319_v26 = vpop.permute.xlu0 %1318 }
 0x106   :  { %vm2020_vm10 = vcmp.eq.s32.totalorder %v3862_v44, %v1928_v37  ;;  %vm1411_vm11 = vcmp.eq.s32.totalorder %v3862_v44, %v1319_v26 }
 0x107   :  { %v2709_v28 = vsel %vm2020_vm10, 1.0, %v3523_v62  ;;  %v2644_v29 = vsel %vm1411_vm11, 1.0, %v3523_v62 }
 0x108   :  { %3128 = vmatmul.mubr.msk.f32.vlgmr.msra.gmra.mxu0 %vm282_vm1, %v2644_v29  ;;  %3202 = vmatmul.mubr.msk.f32.vlgmr.msra.gmra.mxu1 %vm282_vm1, %v2709_v28 }
 0x109   :  { %v1931_v27 = vpop.permute.xlu1 %1930  ;;  %v1322_v30 = vpop.permute.xlu0 %1321 }
 0x10a   :  { %vm2021_vm0 = vcmp.eq.s32.totalorder %v3862_v44, %v1931_v27  ;;  %vm1412_vm12 = vcmp.eq.s32.totalorder %v3862_v44, %v1322_v30 }
 0x10b   :  { %v2710_v61 = vsel %vm2021_vm0, 1.0, %v3523_v62  ;;  %v2645_v31 = vsel %vm1412_vm12, 1.0, %v3523_v62 }
 0x10c   :  { %3130 = vmatprep.mubr.msk.f32.mxu0 %vm282_vm1, %v2645_v31  ;;  %3204 = vmatprep.mubr.msk.f32.mxu1 %vm282_vm1, %v2710_v61 }
 0x10d   :  { %v1934_v32 = vpop.permute.xlu1 %1933  ;;  %v1325_v33 = vpop.permute.xlu0 %1324 }
 0x10e   :  { %vm2022_vm13 = vcmp.eq.s32.totalorder %v3862_v44, %v1934_v32  ;;  %vm1413_vm14 = vcmp.eq.s32.totalorder %v3862_v44, %v1325_v33 }
 0x10f   :  { %v2711_v34 = vsel %vm2022_vm13, 1.0, %v3523_v62  ;;  %v2646_v35 = vsel %vm1413_vm14, 1.0, %v3523_v62 }
 0x110   :  { %3131 = vmatmul.mubr.msk.f32.gmra.mxu0 %vm282_vm1, %v2646_v35  ;;  %3205 = vmatmul.mubr.msk.f32.gmra.mxu1 %vm282_vm1, %v2711_v34 }
 0x111   :  { %v1937_v38 = vpop.permute.xlu1 %1936  ;;  %v1328_v36 = vpop.permute.xlu0 %1327 }
 0x112   :  { %vm2023_vm15 = vcmp.eq.s32.totalorder %v3862_v44, %v1937_v38  ;;  %vm1414_vm2 = vcmp.eq.s32.totalorder %v3862_v44, %v1328_v36 }
 0x113   :  { %v2712_v39 = vsel %vm2023_vm15, 1.0, %v3523_v62  ;;  %v2647_v40 = vsel %vm1414_vm2, 1.0, %v3523_v62 }
 0x114   :  { %3133 = vmatprep.mubr.msk.f32.mxu0 %vm282_vm1, %v2647_v40  ;;  %3207 = vmatprep.mubr.msk.f32.mxu1 %vm282_vm1, %v2712_v39 }
 0x115   :  { %v1940_v4 = vpop.permute.xlu1 %1939  ;;  %v1331_v41 = vpop.permute.xlu0 %1330 }
 0x116   :  { %vm2024_vm3 = vcmp.eq.s32.totalorder %v3862_v44, %v1940_v4  ;;  %vm1415_vm4 = vcmp.eq.s32.totalorder %v3862_v44, %v1331_v41 }
 0x117   :  { %v2713_v42 = vsel %vm2024_vm3, 1.0, %v3523_v62  ;;  %v2648_v45 = vsel %vm1415_vm4, 1.0, %v3523_v62 }
 0x118   :  { %3134 = vmatmul.mubr.msk.f32.gmra.mxu0 %vm282_vm1, %v2648_v45  ;;  %3208 = vmatmul.mubr.msk.f32.gmra.mxu1 %vm282_vm1, %v2713_v42 }
 0x119   :  { %v1943_v47 = vpop.permute.xlu1 %1942  ;;  %v1334_v48 = vpop.permute.xlu0 %1333 }
 0x11a   :  { %vm2025_vm5 = vcmp.eq.s32.totalorder %v3862_v44, %v1943_v47  ;;  %vm1416_vm6 = vcmp.eq.s32.totalorder %v3862_v44, %v1334_v48 }
 0x11b   :  { %v2714_v49 = vsel %vm2025_vm5, 1.0, %v3523_v62  ;;  %v2649_v43 = vsel %vm1416_vm6, 1.0, %v3523_v62 }
 0x11c   :  { %3136 = vmatprep.mubr.msk.f32.mxu0 %vm282_vm1, %v2649_v43  ;;  %3210 = vmatprep.mubr.msk.f32.mxu1 %vm282_vm1, %v2714_v49 }
 0x11d   :  { %v1946_v50 = vpop.permute.xlu1 %1945  ;;  %v1337_v51 = vpop.permute.xlu0 %1336 }
 0x11e   :  { %vm2026_vm7 = vcmp.eq.s32.totalorder %v3862_v44, %v1946_v50  ;;  %vm1417_vm8 = vcmp.eq.s32.totalorder %v3862_v44, %v1337_v51 }
 0x11f   :  { %v2715_v9 = vsel %vm2026_vm7, 1.0, %v3523_v62  ;;  %v2650_v52 = vsel %vm1417_vm8, 1.0, %v3523_v62 }
 0x120   :  { %3137 = vmatmul.mubr.msk.f32.gmra.mxu0 %vm282_vm1, %v2650_v52  ;;  %3211 = vmatmul.mubr.msk.f32.gmra.mxu1 %vm282_vm1, %v2715_v9 }
 0x121   :  { %v1949_v54 = vpop.permute.xlu1 %1948  ;;  %v1340_v55 = vpop.permute.xlu0 %1339 }
 0x122   :  { %vm2027_vm9 = vcmp.eq.s32.totalorder %v3862_v44, %v1949_v54  ;;  %vm1418_vm10 = vcmp.eq.s32.totalorder %v3862_v44, %v1340_v55 }
 0x123   :  { %v2716_v56 = vsel %vm2027_vm9, 1.0, %v3523_v62  ;;  %v2651_v57 = vsel %vm1418_vm10, 1.0, %v3523_v62 }
 0x124   :  { %3139 = vmatprep.mubr.msk.f32.mxu0 %vm282_vm1, %v2651_v57  ;;  %3213 = vmatprep.mubr.msk.f32.mxu1 %vm282_vm1, %v2716_v56 }
 0x125   :  { %v1952_v59 = vpop.permute.xlu1 %1951  ;;  %v1343_v60 = vpop.permute.xlu0 %1342 }
 0x126   :  { %vm2028_vm11 = vcmp.eq.s32.totalorder %v3862_v44, %v1952_v59  ;;  %vm1419_vm0 = vcmp.eq.s32.totalorder %v3862_v44, %v1343_v60 }
 0x127   :  { %v2717_v46 = vsel %vm2028_vm11, 1.0, %v3523_v62  ;;  %v2652_v63 = vsel %vm1419_vm0, 1.0, %v3523_v62 }
 0x128   :  { %3140 = vmatmul.mubr.msk.f32.gmra.mxu0 %vm282_vm1, %v2652_v63  ;;  %3214 = vmatmul.mubr.msk.f32.gmra.mxu1 %vm282_vm1, %v2717_v46 }
 0x129   :  { %v1955_v12 = vpop.permute.xlu1 %1954  ;;  %v1346_v0 = vpop.permute.xlu0 %1345 }
 0x12a   :  { %vm2029_vm12 = vcmp.eq.s32.totalorder %v3862_v44, %v1955_v12  ;;  %vm1420_vm13 = vcmp.eq.s32.totalorder %v3862_v44, %v1346_v0 }
 0x12b   :  { %v2718_v1 = vsel %vm2029_vm12, 1.0, %v3523_v62  ;;  %v2653_v2 = vsel %vm1420_vm13, 1.0, %v3523_v62  ;;  %vm608_vm13 = vcmask 64512  }
 0x12c   :  { %3142 = vmatprep.mubr.msk.f32.mxu0 %vm282_vm1, %v2653_v2  ;;  %3216 = vmatprep.mubr.msk.f32.mxu1 %vm282_vm1, %v2718_v1 }
 0x12d   :  { %v1958_v3 = vpop.permute.xlu1 %1957  ;;  %v1349_v5 = vpop.permute.xlu0 %1348 }
 0x12e   :  { %vm2030_vm14 = vcmp.eq.s32.totalorder %v3862_v44, %v1958_v3  ;;  %vm1421_vm15 = vcmp.eq.s32.totalorder %v3862_v44, %v1349_v5 }
 0x12f   :  { %v2719_v6 = vsel %vm2030_vm14, 1.0, %v3523_v62  ;;  %v2654_v7 = vsel %vm1421_vm15, 1.0, %v3523_v62 }
 0x130   :  { %3143 = vmatmul.mubr.msk.f32.gmra.mxu0 %vm282_vm1, %v2654_v7  ;;  %3217 = vmatmul.mubr.msk.f32.gmra.mxu1 %vm282_vm1, %v2719_v6 }
 0x131   :  { %v1961_v8 = vpop.permute.xlu1 %1960  ;;  %v1352_v53 = vpop.permute.xlu0 %1351 }
 0x132   :  { %vm2031_vm2 = vcmp.eq.s32.totalorder %v3862_v44, %v1961_v8  ;;  %vm1422_vm3 = vcmp.eq.s32.totalorder %v3862_v44, %v1352_v53 }
 0x133   :  { %v2720_v19 = vsel %vm2031_vm2, 1.0, %v3523_v62  ;;  %v2655_v10 = vsel %vm1422_vm3, 1.0, %v3523_v62 }
 0x134   :  { %3145 = vmatprep.mubr.msk.f32.mxu0 %vm282_vm1, %v2655_v10  ;;  %3219 = vmatprep.mubr.msk.f32.mxu1 %vm282_vm1, %v2720_v19 }
 0x135   :  { %v1964_v11 = vpop.permute.xlu1 %1963  ;;  %v1355_v13 = vpop.permute.xlu0 %1354 }
 0x136   :  { %vm2032_vm4 = vcmp.eq.s32.totalorder %v3862_v44, %v1964_v11  ;;  %vm1423_vm5 = vcmp.eq.s32.totalorder %v3862_v44, %v1355_v13 }
 0x137   :  { %v2721_v14 = vsel %vm2032_vm4, 1.0, %v3523_v62  ;;  %v2656_v15 = vsel %vm1423_vm5, 1.0, %v3523_v62 }
 0x138   :  { %3146 = vmatmul.mubr.msk.f32.gmra.mxu0 %vm282_vm1, %v2656_v15  ;;  %3220 = vmatmul.mubr.msk.f32.gmra.mxu1 %vm282_vm1, %v2721_v14 }
 0x139   :  { %v1967_v16 = vpop.permute.xlu1 %1966  ;;  %v1358_v17 = vpop.permute.xlu0 %1357 }
 0x13a   :  { %vm2033_vm6 = vcmp.eq.s32.totalorder %v3862_v44, %v1967_v16  ;;  %vm1424_vm7 = vcmp.eq.s32.totalorder %v3862_v44, %v1358_v17 }
 0x13b   :  { %v2722_v18 = vsel %vm2033_vm6, 1.0, %v3523_v62  ;;  %v2657_v20 = vsel %vm1424_vm7, 1.0, %v3523_v62 }
 0x13c   :  { %3148 = vmatprep.mubr.msk.f32.mxu0 %vm282_vm1, %v2657_v20  ;;  %3222 = vmatprep.mubr.msk.f32.mxu1 %vm282_vm1, %v2722_v18 }
 0x13d   :  { %v1970_v24 = vpop.permute.xlu1 %1969  ;;  %v1361_v58 = vpop.permute.xlu0 %1360 }
 0x13e   :  { %vm2034_vm8 = vcmp.eq.s32.totalorder %v3862_v44, %v1970_v24  ;;  %vm1425_vm9 = vcmp.eq.s32.totalorder %v3862_v44, %v1361_v58 }
 0x13f   :  { %v2723_v21 = vsel %vm2034_vm8, 1.0, %v3523_v62  ;;  %v2658_v22 = vsel %vm1425_vm9, 1.0, %v3523_v62 }
 0x140   :  { %3149 = vmatmul.mubr.msk.f32.gmra.mxu0 %vm282_vm1, %v2658_v22  ;;  %3223 = vmatmul.mubr.msk.f32.gmra.mxu1 %vm282_vm1, %v2723_v21 }
 0x141   :  { %v1973_v23 = vpop.permute.xlu1 %1972  ;;  %v1364_v25 = vpop.permute.xlu0 %1363 }
 0x142   :  { %vm2035_vm10 = vcmp.eq.s32.totalorder %v3862_v44, %v1973_v23  ;;  %vm1426_vm11 = vcmp.eq.s32.totalorder %v3862_v44, %v1364_v25 }
 0x143   :  { %v2724_v37 = vsel %vm2035_vm10, 1.0, %v3523_v62  ;;  %v2659_v26 = vsel %vm1426_vm11, 1.0, %v3523_v62 }
 0x144   :  { %3151 = vmatprep.mubr.msk.f32.mxu0 %vm282_vm1, %v2659_v26  ;;  %3225 = vmatprep.mubr.msk.f32.mxu1 %vm282_vm1, %v2724_v37 }
 0x145   :  { %v1976_v28 = vpop.permute.xlu1 %1975  ;;  %v1367_v29 = vpop.permute.xlu0 %1366 }
 0x146   :  { %vm2036_vm0 = vcmp.eq.s32.totalorder %v3862_v44, %v1976_v28  ;;  %vm1427_vm12 = vcmp.eq.s32.totalorder %v3862_v44, %v1367_v29 }
 0x147   :  { %v2725_v27 = vsel %vm2036_vm0, 1.0, %v3523_v62  ;;  %v2660_v30 = vsel %vm1427_vm12, 1.0, %v3523_v62 }
 0x148   :  { %v2981_v61 = vpop.f32.mrf.mxu0  ;;  %3152 = vmatmul.mubr.msk.f32.gmra.mxu0 %vm282_vm1, %v2660_v30  ;;  %3226 = vmatmul.mubr.msk.f32.gmra.mxu1 %vm282_vm1, %v2725_v27 }
 0x149   :  { %610 = vst.msk [vmem:[#allocation2 + $0x8] sm:$0xff] %vm608_vm13, %v2981_v61  ;;  %v1979_v31 = vpop.permute.xlu1 %1978  ;;  %v1370_v32 = vpop.permute.xlu0 %1369 }
 0x14a   :  { %vm2037_vm14 = vcmp.eq.s32.totalorder %v3862_v44, %v1979_v31  ;;  %vm1428_vm15 = vcmp.eq.s32.totalorder %v3862_v44, %v1370_v32  ;;  %v449_v33 = vpop.f32.mrf.mxu0 }
 0x14b   :  { %v2726_v34 = vsel %vm2037_vm14, 1.0, %v3523_v62  ;;  %v2661_v35 = vsel %vm1428_vm15, 1.0, %v3523_v62  ;;  %609 = vst.msk [vmem:[#allocation2] sm:$0xff] %vm608_vm13, %v449_v33 }
 0x14c   :  { %v2984_v38 = vpop.f32.mrf.mxu0  ;;  %3154 = vmatprep.mubr.msk.f32.mxu0 %vm282_vm1, %v2661_v35  ;;  %3228 = vmatprep.mubr.msk.f32.mxu1 %vm282_vm1, %v2726_v34 }
 0x14d   :  { %v1982_v36 = vpop.permute.xlu1 %1981  ;;  %v1373_v39 = vpop.permute.xlu0 %1372 }
 0x14e   :  { %vm2038_vm2 = vcmp.eq.s32.totalorder %v3862_v44, %v1982_v36  ;;  %vm1429_vm3 = vcmp.eq.s32.totalorder %v3862_v44, %v1373_v39  ;;  %v459_v40 = vpop.f32.mrf.mxu0 }
 0x14f   :  { %v2727_v4 = vsel %vm2038_vm2, 1.0, %v3523_v62  ;;  %v2662_v41 = vsel %vm1429_vm3, 1.0, %v3523_v62 }
 0x150   :  { %v2502_v42 = vld [vmem:[#allocation2 + $0x8] sm:$0xff]  ;;  %v2987_v45 = vpop.f32.mrf.mxu0  ;;  %3155 = vmatmul.mubr.msk.f32.gmra.mxu0 %vm282_vm1, %v2662_v41  ;;  %3229 = vmatmul.mubr.msk.f32.gmra.mxu1 %vm282_vm1, %v2727_v4 }
 0x151   :  { %2503 = vst [vmem:[%s4508_s2 + $0x8] sm:$0xff] %v2502_v42  ;;  %v1985_v47 = vpop.permute.xlu1 %1984  ;;  %v1376_v48 = vpop.permute.xlu0 %1375 }
 0x152   :  { %v2500_v49 = vld [vmem:[#allocation2] sm:$0xff]  ;;  %vm2039_vm4 = vcmp.eq.s32.totalorder %v3862_v44, %v1985_v47  ;;  %vm1430_vm5 = vcmp.eq.s32.totalorder %v3862_v44, %v1376_v48  ;;  %v469_v43 = vpop.f32.mrf.mxu0 }
 0x153   :  { %2501 = vst [vmem:[%s4508_s2] sm:$0xff] %v2500_v49  ;;  %v2728_v50 = vsel %vm2039_vm4, 1.0, %v3523_v62  ;;  %v2663_v51 = vsel %vm1430_vm5, 1.0, %v3523_v62 }
 0x154   :  { %v2990_v9 = vpop.f32.mrf.mxu0  ;;  %3157 = vmatprep.mubr.msk.f32.mxu0 %vm282_vm1, %v2663_v51  ;;  %3231 = vmatprep.mubr.msk.f32.mxu1 %vm282_vm1, %v2728_v50 }
 0x155   :  { %v1988_v52 = vpop.permute.xlu1 %1987  ;;  %v1379_v54 = vpop.permute.xlu0 %1378 }
 0x156   :  { %vm2040_vm6 = vcmp.eq.s32.totalorder %v3862_v44, %v1988_v52  ;;  %vm1431_vm7 = vcmp.eq.s32.totalorder %v3862_v44, %v1379_v54  ;;  %v479_v55 = vpop.f32.mrf.mxu0 }
 0x157   :  { %v2729_v56 = vsel %vm2040_vm6, 1.0, %v3523_v62  ;;  %v2664_v57 = vsel %vm1431_vm7, 1.0, %v3523_v62 }
 0x158   :  { %v2993_v59 = vpop.f32.mrf.mxu0  ;;  %3158 = vmatmul.mubr.msk.f32.gmra.mxu0 %vm282_vm1, %v2664_v57  ;;  %3232 = vmatmul.mubr.msk.f32.gmra.mxu1 %vm282_vm1, %v2729_v56 }
 0x159   :  { %v1991_v60 = vpop.permute.xlu1 %1990  ;;  %v1382_v46 = vpop.permute.xlu0 %1381 }
 0x15a   :  { %vm2041_vm8 = vcmp.eq.s32.totalorder %v3862_v44, %v1991_v60  ;;  %vm1432_vm9 = vcmp.eq.s32.totalorder %v3862_v44, %v1382_v46  ;;  %v489_v63 = vpop.f32.mrf.mxu0 }
 0x15b   :  { %v2730_v12 = vsel %vm2041_vm8, 1.0, %v3523_v62  ;;  %v2665_v0 = vsel %vm1432_vm9, 1.0, %v3523_v62 }
 0x15c   :  { %v2996_v1 = vpop.f32.mrf.mxu0  ;;  %3160 = vmatprep.mubr.msk.f32.mxu0 %vm282_vm1, %v2665_v0  ;;  %3234 = vmatprep.mubr.msk.f32.mxu1 %vm282_vm1, %v2730_v12 }
 0x15d   :  { %v1994_v2 = vpop.permute.xlu1 %1993  ;;  %v1385_v3 = vpop.permute.xlu0 %1384 }
 0x15e   :  { %vm2042_vm10 = vcmp.eq.s32.totalorder %v3862_v44, %v1994_v2  ;;  %vm1433_vm11 = vcmp.eq.s32.totalorder %v3862_v44, %v1385_v3  ;;  %v499_v5 = vpop.f32.mrf.mxu0 }
 0x15f   :  { %v2731_v6 = vsel %vm2042_vm10, 1.0, %v3523_v62  ;;  %v2666_v7 = vsel %vm1433_vm11, 1.0, %v3523_v62 }
 0x160   :  { %v2999_v8 = vpop.f32.mrf.mxu0  ;;  %3161 = vmatmul.mubr.msk.f32.gmra.mxu0 %vm282_vm1, %v2666_v7  ;;  %3235 = vmatmul.mubr.msk.f32.gmra.mxu1 %vm282_vm1, %v2731_v6 }
 0x161   :  { %v1997_v53 = vpop.permute.xlu1 %1996  ;;  %v1388_v19 = vpop.permute.xlu0 %1387 }
 0x162   :  { %vm2043_vm0 = vcmp.eq.s32.totalorder %v3862_v44, %v1997_v53  ;;  %vm1434_vm12 = vcmp.eq.s32.totalorder %v3862_v44, %v1388_v19  ;;  %v509_v10 = vpop.f32.mrf.mxu0 }
 0x163   :  { %v2732_v11 = vsel %vm2043_vm0, 1.0, %v3523_v62  ;;  %v2667_v13 = vsel %vm1434_vm12, 1.0, %v3523_v62 }
 0x164   :  { %v3002_v14 = vpop.f32.mrf.mxu0  ;;  %3163 = vmatprep.mubr.msk.f32.mxu0 %vm282_vm1, %v2667_v13  ;;  %3237 = vmatprep.mubr.msk.f32.mxu1 %vm282_vm1, %v2732_v11 }
 0x165   :  { %v2000_v15 = vpop.permute.xlu1 %1999  ;;  %v1391_v16 = vpop.permute.xlu0 %1390 }
 0x166   :  { %vm2044_vm13 = vcmp.eq.s32.totalorder %v3862_v44, %v2000_v15  ;;  %vm1435_vm14 = vcmp.eq.s32.totalorder %v3862_v44, %v1391_v16  ;;  %v519_v17 = vpop.f32.mrf.mxu0 }
 0x167   :  { %v2733_v18 = vsel %vm2044_vm13, 1.0, %v3523_v62  ;;  %v2668_v20 = vsel %vm1435_vm14, 1.0, %v3523_v62 }
 0x168   :  { %v3005_v24 = vpop.f32.mrf.mxu0  ;;  %3164 = vmatmul.mubr.msk.f32.gmra.mxu0 %vm282_vm1, %v2668_v20  ;;  %3238 = vmatmul.mubr.msk.f32.gmra.mxu1 %vm282_vm1, %v2733_v18 }
 0x169   :  { %v2003_v58 = vpop.permute.xlu1 %2002  ;;  %v1394_v21 = vpop.permute.xlu0 %1393 }
 0x16a   :  { %vm2045_vm15 = vcmp.eq.s32.totalorder %v3862_v44, %v2003_v58  ;;  %vm1436_vm2 = vcmp.eq.s32.totalorder %v3862_v44, %v1394_v21  ;;  %v529_v22 = vpop.f32.mrf.mxu0 }
 0x16b   :  { %v2734_v23 = vsel %vm2045_vm15, 1.0, %v3523_v62  ;;  %v2669_v25 = vsel %vm1436_vm2, 1.0, %v3523_v62 }
 0x16c   :  { %v3008_v37 = vpop.f32.mrf.mxu0  ;;  %3166 = vmatprep.mubr.msk.f32.mxu0 %vm282_vm1, %v2669_v25  ;;  %3240 = vmatprep.mubr.msk.f32.mxu1 %vm282_vm1, %v2734_v23 }
 0x16d   :  { %v2006_v26 = vpop.permute.xlu1 %2005  ;;  %v1397_v28 = vpop.permute.xlu0 %1396 }
 0x16e   :  { %vm2046_vm3 = vcmp.eq.s32.totalorder %v3862_v44, %v2006_v26  ;;  %vm1437_vm4 = vcmp.eq.s32.totalorder %v3862_v44, %v1397_v28  ;;  %v539_v29 = vpop.f32.mrf.mxu0 }
 0x16f   :  { %v2735_v27 = vsel %vm2046_vm3, 1.0, %v3523_v62  ;;  %v2670_v30 = vsel %vm1437_vm4, 1.0, %v3523_v62 }
 0x170   :  { %v3011_v61 = vpop.f32.mrf.mxu0  ;;  %3167 = vmatmul.mubr.msk.f32.gmra.mxu0 %vm282_vm1, %v2670_v30  ;;  %3241 = vmatmul.mubr.msk.f32.gmra.mxu1 %vm282_vm1, %v2735_v27 }
 0x171   :  { %v2009_v31 = vpop.permute.xlu1 %2008  ;;  %v1400_v32 = vpop.permute.xlu0 %1399 }
 0x172   :  { %vm2047_vm5 = vcmp.eq.s32.totalorder %v3862_v44, %v2009_v31  ;;  %vm1438_vm6 = vcmp.eq.s32.totalorder %v3862_v44, %v1400_v32  ;;  %v549_v33 = vpop.f32.mrf.mxu0 }
 0x173   :  { %v2736_v34 = vsel %vm2047_vm5, 1.0, %v3523_v62  ;;  %v2671_v35 = vsel %vm1438_vm6, 1.0, %v3523_v62 }
 0x174   :  { %v3014_v38 = vpop.f32.mrf.mxu0  ;;  %3169 = vmatprep.mubr.msk.f32.mxu0 %vm282_vm1, %v2671_v35  ;;  %3243 = vmatprep.mubr.msk.f32.mxu1 %vm282_vm1, %v2736_v34 }
 0x175   :  { %v2012_v36 = vpop.permute.xlu1 %2011  ;;  %v1403_v39 = vpop.permute.xlu0 %1402 }
 0x176   :  { %vm2048_vm7 = vcmp.eq.s32.totalorder %v3862_v44, %v2012_v36  ;;  %vm1439_vm8 = vcmp.eq.s32.totalorder %v3862_v44, %v1403_v39  ;;  %v559_v40 = vpop.f32.mrf.mxu0 }
 0x177   :  { %v2737_v4 = vsel %vm2048_vm7, 1.0, %v3523_v62  ;;  %v2672_v41 = vsel %vm1439_vm8, 1.0, %v3523_v62 }
 0x178   :  { %v3017_v42 = vpop.f32.mrf.mxu0  ;;  %3170 = vmatmul.mubr.msk.f32.gmra.mxu0 %vm282_vm1, %v2672_v41  ;;  %3244 = vmatmul.mubr.msk.f32.gmra.mxu1 %vm282_vm1, %v2737_v4 }
 0x179   :  { %v2015_v45 = vpop.permute.xlu1 %2014  ;;  %v1406_v47 = vpop.permute.xlu0 %1405 }
 0x17a   :  { %vm2049_vm9 = vcmp.eq.s32.totalorder %v3862_v44, %v2015_v45  ;;  %vm1440_vm10 = vcmp.eq.s32.totalorder %v3862_v44, %v1406_v47  ;;  %v569_v48 = vpop.f32.mrf.mxu0 }
 0x17b   :  { %v2738_v49 = vsel %vm2049_vm9, 1.0, %v3523_v62  ;;  %v2673_v43 = vsel %vm1440_vm10, 1.0, %v3523_v62 }
 0x17c   :  { %v3020_v50 = vpop.f32.mrf.mxu0  ;;  %3172 = vmatprep.mubr.msk.f32.mxu0 %vm282_vm1, %v2673_v43  ;;  %3246 = vmatprep.mubr.msk.f32.mxu1 %vm282_vm1, %v2738_v49 }
 0x17d   :  { %v2018_v51 = vpop.permute.xlu1 %2017  ;;  %v1409_v9 = vpop.permute.xlu0 %1408 }
 0x17e   :  { %vm2050_vm11 = vcmp.eq.s32.totalorder %v3862_v44, %v2018_v51  ;;  %vm1441_vm0 = vcmp.eq.s32.totalorder %v3862_v44, %v1409_v9  ;;  %v579_v52 = vpop.f32.mrf.mxu0 }
 0x17f   :  { %v2739_v54 = vsel %vm2050_vm11, 1.0, %v3523_v62  ;;  %v2674_v55 = vsel %vm1441_vm0, 1.0, %v3523_v62 }
 0x180   :  { %v3023_v56 = vpop.f32.mrf.mxu0  ;;  %3173 = vmatmul.mubr.msk.f32.gmra.mxu0 %vm282_vm1, %v2674_v55  ;;  %3247 = vmatmul.mubr.msk.f32.gmra.mxu1 %vm282_vm1, %v2739_v54 }
 0x182   :  { %v589_v57 = vpop.f32.mrf.mxu0 }
 0x184   :  { %v3026_v59 = vpop.f32.mrf.mxu0 }
 0x185   :  { %v3055_v60 = vpop.f32.mrf.mxu1 }
 0x186   :  { %v599_v46 = vpop.f32.mrf.mxu0 }
 0x187   :  { %v1059_v63 = vpop.f32.mrf.mxu1 }
 0x189   :  { %v3058_v12 = vpop.f32.mrf.mxu1 }
 0x18b   :  { %v1069_v0 = vpop.f32.mrf.mxu1 }
 0x18d   :  { %v3061_v1 = vpop.f32.mrf.mxu1 }
 0x18f   :  { %v1079_v2 = vpop.f32.mrf.mxu1 }
 0x191   :  { %v3064_v44 = vpop.f32.mrf.mxu1 }
 0x193   :  { %v1089_v3 = vpop.f32.mrf.mxu1 }
 0x195   :  { %v3067_v5 = vpop.f32.mrf.mxu1 }
 0x197   :  { %v1099_v6 = vpop.f32.mrf.mxu1 }
 0x199   :  { %v3070_v7 = vpop.f32.mrf.mxu1 }
 0x19b   :  { %v1109_v62 = vpop.f32.mrf.mxu1 }
 0x19d   :  { %v3073_v8 = vpop.f32.mrf.mxu1 }
 0x19f   :  { %v1119_v53 = vpop.f32.mrf.mxu1 }
 0x1a1   :  { %v3076_v19 = vpop.f32.mrf.mxu1 }
 0x1a3   :  { %v1129_v10 = vpop.f32.mrf.mxu1 }
 0x1a5   :  { %v3079_v11 = vpop.f32.mrf.mxu1 }
 0x1a7   :  { %v1139_v13 = vpop.f32.mrf.mxu1 }
 0x1a9   :  { %v3082_v14 = vpop.f32.mrf.mxu1 }
 0x1ab   :  { %v1149_v15 = vpop.f32.mrf.mxu1 }
 0x1ad   :  { %v3085_v16 = vpop.f32.mrf.mxu1 }
 0x1af   :  { %v1159_v17 = vpop.f32.mrf.mxu1 }
 0x1b1   :  { %v3088_v18 = vpop.f32.mrf.mxu1 }
 0x1b3   :  { %v1169_v20 = vpop.f32.mrf.mxu1 }
 0x1b5   :  { %v3091_v24 = vpop.f32.mrf.mxu1 }
 0x1b7   :  { %v1179_v58 = vpop.f32.mrf.mxu1 }
 0x1b9   :  { %v3094_v21 = vpop.f32.mrf.mxu1 }
 0x1bb   :  { %v1189_v22 = vpop.f32.mrf.mxu1 }
 0x1bd   :  { %v3097_v23 = vpop.f32.mrf.mxu1 }
 0x1bf   :  { %v1199_v25 = vpop.f32.mrf.mxu1 }
 0x1c1   :  { %v3100_v37 = vpop.f32.mrf.mxu1 }
 0x1c3   :  { %v1209_v26 = vpop.f32.mrf.mxu1 }
 0x1c8   :  { %v3129_v28 = vpop.f32.mrf.mxu0  ;;  %v3203_v29 = vpop.f32.mrf.mxu1 }
 0x1ca   :  { %v1668_v27 = vpop.f32.mrf.mxu0  ;;  %v2277_v30 = vpop.f32.mrf.mxu1 }
 0x1d0   :  { %v3132_v61 = vpop.f32.mrf.mxu0  ;;  %v3206_v31 = vpop.f32.mrf.mxu1 }
 0x1d2   :  { %v1678_v32 = vpop.f32.mrf.mxu0  ;;  %v2287_v33 = vpop.f32.mrf.mxu1 }
 0x1d8   :  { %v3135_v34 = vpop.f32.mrf.mxu0  ;;  %v3209_v35 = vpop.f32.mrf.mxu1 }
 0x1da   :  { %v1688_v38 = vpop.f32.mrf.mxu0  ;;  %v2297_v36 = vpop.f32.mrf.mxu1 }
 0x1e0   :  { %v3138_v39 = vpop.f32.mrf.mxu0  ;;  %v3212_v40 = vpop.f32.mrf.mxu1 }
 0x1e2   :  { %v1698_v4 = vpop.f32.mrf.mxu0  ;;  %v2307_v41 = vpop.f32.mrf.mxu1 }
 0x1e8   :  { %v3141_v42 = vpop.f32.mrf.mxu0  ;;  %v3215_v45 = vpop.f32.mrf.mxu1 }
 0x1ea   :  { %v1708_v47 = vpop.f32.mrf.mxu0  ;;  %v2317_v48 = vpop.f32.mrf.mxu1 }
 0x1f0   :  { %v3144_v49 = vpop.f32.mrf.mxu0  ;;  %v3218_v43 = vpop.f32.mrf.mxu1 }
 0x1f2   :  { %v1718_v50 = vpop.f32.mrf.mxu0  ;;  %v2327_v51 = vpop.f32.mrf.mxu1 }
 0x1f8   :  { %v3147_v9 = vpop.f32.mrf.mxu0  ;;  %v3221_v52 = vpop.f32.mrf.mxu1 }
 0x1fa   :  { %v1728_v54 = vpop.f32.mrf.mxu0  ;;  %v2337_v55 = vpop.f32.mrf.mxu1 }
 0x200   :  { %v3150_v56 = vpop.f32.mrf.mxu0  ;;  %v3224_v57 = vpop.f32.mrf.mxu1 }
 0x202   :  { %v1738_v59 = vpop.f32.mrf.mxu0  ;;  %v2347_v60 = vpop.f32.mrf.mxu1 }
 0x208   :  { %v3153_v46 = vpop.f32.mrf.mxu0  ;;  %v3227_v63 = vpop.f32.mrf.mxu1 }
 0x20a   :  { %v1748_v12 = vpop.f32.mrf.mxu0  ;;  %v2357_v0 = vpop.f32.mrf.mxu1 }
 0x210   :  { %v3156_v1 = vpop.f32.mrf.mxu0  ;;  %v3230_v2 = vpop.f32.mrf.mxu1 }
 0x212   :  { %v1758_v44 = vpop.f32.mrf.mxu0  ;;  %v2367_v3 = vpop.f32.mrf.mxu1 }
 0x218   :  { %v3159_v5 = vpop.f32.mrf.mxu0  ;;  %v3233_v6 = vpop.f32.mrf.mxu1 }
 0x21a   :  { %v1768_v7 = vpop.f32.mrf.mxu0  ;;  %v2377_v62 = vpop.f32.mrf.mxu1 }
 0x220   :  { %v3162_v8 = vpop.f32.mrf.mxu0  ;;  %v3236_v53 = vpop.f32.mrf.mxu1 }
 0x222   :  { %v1778_v19 = vpop.f32.mrf.mxu0  ;;  %v2387_v10 = vpop.f32.mrf.mxu1 }
 0x228   :  { %v3165_v11 = vpop.f32.mrf.mxu0  ;;  %v3239_v13 = vpop.f32.mrf.mxu1 }
 0x22a   :  { %v1788_v14 = vpop.f32.mrf.mxu0  ;;  %v2397_v15 = vpop.f32.mrf.mxu1 }
 0x230   :  { %v3168_v16 = vpop.f32.mrf.mxu0  ;;  %v3242_v17 = vpop.f32.mrf.mxu1 }
 0x232   :  { %v1798_v18 = vpop.f32.mrf.mxu0  ;;  %v2407_v20 = vpop.f32.mrf.mxu1 }
 0x238   :  { %v3171_v24 = vpop.f32.mrf.mxu0  ;;  %v3245_v58 = vpop.f32.mrf.mxu1 }
 0x23a   :  { %v1808_v21 = vpop.f32.mrf.mxu0  ;;  %v2417_v22 = vpop.f32.mrf.mxu1 }
 0x240   :  { %v3174_v23 = vpop.f32.mrf.mxu0  ;;  %v3248_v25 = vpop.f32.mrf.mxu1 }
 0x242   :  { %v1818_v37 = vpop.f32.mrf.mxu0  ;;  %v2427_v26 = vpop.f32.mrf.mxu1 }

</bundles_post_ra>
